<compile_context>
chip_gen: v7x
topology: tpu7x:2x2x1
jax: 0.10.0
libtpu: 0.0.40
codegen_flags: <defaults>
</compile_context>

<pallas_src>
import functools

import jax
import jax.numpy as jnp
from jax.experimental import pallas as pl
from jax.experimental.pallas import tpu as pltpu

DROPOUT_PROB = 0.2
# keep an element  <=>  uniform_u32 >= p * 2^32   (keep prob = 1 - p)
_KEEP_THRESHOLD = int(round(DROPOUT_PROB * (1 << 32)))
_DROPOUT_SCALE = 1.0 / (1.0 - DROPOUT_PROB)


def _ffwd_kernel(x_ref, w1_ref, b1_ref, w2_ref, b2_ref, rnd_ref, o_ref, *,
                 apply_dropout):
    # Linear 1: bf16 MXU matmul, f32 accumulate; bias add + ReLU in f32.
    h = jnp.dot(x_ref[...], w1_ref[...], preferred_element_type=jnp.float32)
    h = jnp.maximum(h + b1_ref[...], 0.0)

    # Linear 2: cast the activation back to bf16 for the MXU, accumulate f32.
    y = jnp.dot(h.astype(jnp.bfloat16), w2_ref[...],
                preferred_element_type=jnp.float32) + b2_ref[...]

    if apply_dropout:
        # Integer-domain keep test: no shift/convert/scale on the VPU.
        keep = rnd_ref[...] >= jnp.uint32(_KEEP_THRESHOLD)
        y = jnp.where(keep, y * jnp.float32(_DROPOUT_SCALE), jnp.float32(0.0))

    o_ref[...] = y.astype(o_ref.dtype)


def feed_forward(x, w1, b1, w2, b2, dropout_key, *, training=True):
    """x: (B, T, C) float32.  w1: (C, 4C), w2: (4C, C) (already (in, out)).
    Returns (B, T, C) float32 matching nn.Sequential(Linear, ReLU, Linear, Dropout)."""
    B, T, C = x.shape
    H = w1.shape[1]
    M = B * T

    # bf16 operands for the MXU; biases stay f32 (added after accumulation).
    x2 = x.reshape(M, C).astype(jnp.bfloat16)
    w1b = w1.astype(jnp.bfloat16)
    w2b = w2.astype(jnp.bfloat16)
    b1_2d = b1.reshape(1, H).astype(jnp.float32)
    b2_2d = b2.reshape(1, C).astype(jnp.float32)

    # Tile over M only (weights resident).  Pad ragged M instead of asserting.
    if M <= 512:
        tm, Mp = M, M
    else:
        tm = 512
        Mp = pl.cdiv(M, tm) * tm
    if Mp != M:
        x2 = jnp.pad(x2, ((0, Mp - M), (0, 0)))

    # Host-side dropout bits (uint32), one per output element.
    rnd = jax.random.bits(dropout_key, (Mp, C), dtype=jnp.uint32)

    # VMEM budget: double-buffered per-step tiles + resident bf16 weights + f32 h.
    tile_bytes = tm * C * (2 + 4 + 4) * 2        # x(bf16) + rnd(u32) + out(f32), 2 bufs
    weight_bytes = 2 * (C * H + H * C) * 2       # W1 + W2 bf16, 2 bufs (constant index)
    bias_bytes = 2 * (H + C) * 4
    scratch_bytes = 2 * tm * H * 4               # f32 intermediate h + headroom
    vmem_bytes = tile_bytes + weight_bytes + bias_bytes + scratch_bytes
    vmem_bytes = int(min(64 * 2**20, max(32 * 2**20, 2 * vmem_bytes)))

    kernel = functools.partial(_ffwd_kernel, apply_dropout=training)

    out = pl.pallas_call(
        kernel,
        out_shape=jax.ShapeDtypeStruct((Mp, C), jnp.float32),
        grid_spec=pltpu.PrefetchScalarGridSpec(
            num_scalar_prefetch=0,
            grid=(Mp // tm,),
            in_specs=[
                pl.BlockSpec((tm, C), lambda i: (i, 0)),   # x tile
                pl.BlockSpec((C, H), lambda i: (0, 0)),    # W1 (resident)
                pl.BlockSpec((1, H), lambda i: (0, 0)),    # b1
                pl.BlockSpec((H, C), lambda i: (0, 0)),    # W2 (resident)
                pl.BlockSpec((1, C), lambda i: (0, 0)),    # b2
                pl.BlockSpec((tm, C), lambda i: (i, 0)),   # dropout bits tile
            ],
            out_specs=pl.BlockSpec((tm, C), lambda i: (i, 0)),
        ),
        compiler_params=pltpu.CompilerParams(
            # Grid steps are fully independent (no in-kernel PRNG state), so the
            # M axis can be sharded across v7x's two TensorCores.
            dimension_semantics=("parallel",),
            vmem_limit_bytes=vmem_bytes,
        ),
    )(x2, w1b, b1_2d, w2b, b2_2d, rnd)

    return out[:M].reshape(B, T, C)


def init_params(key, n_embeds):
    """Deterministic init matching nn.Linear shapes (weights stored as (in, out))."""
    h = 4 * n_embeds
    k1, k2, k3, k4 = jax.random.split(key, 4)
    lim1 = 1.0 / (n_embeds ** 0.5)
    lim2 = 1.0 / (h ** 0.5)
    w1 = jax.random.uniform(k1, (n_embeds, h), jnp.float32, -lim1, lim1)
    b1 = jax.random.uniform(k2, (h,), jnp.float32, -lim1, lim1)
    w2 = jax.random.uniform(k3, (h, n_embeds), jnp.float32, -lim2, lim2)
    b2 = jax.random.uniform(k4, (n_embeds,), jnp.float32, -lim2, lim2)
    return w1, b1, w2, b2


if __name__ == "__main__":
    # Small demo consistent with the module: batch=2, seq=8, n_embeds=384
    # (hidden = 4 * 384 = 1536; both lane-dense multiples of 128).
    B, T, C = 2, 8, 384
    key = jax.random.PRNGKey(0)
    kx, kp, kd = jax.random.split(key, 3)
    x = jax.random.normal(kx, (B, T, C), jnp.float32)
    w1, b1, w2, b2 = init_params(kp, C)

    y = feed_forward(x, w1, b1, w2, b2, dropout_key=kd, training=True)
    y = jax.block_until_ready(y)
    assert y.shape == (B, T, C) and y.dtype == jnp.float32
    print("KERNEL_OK")
</pallas_src>

<mosaic_0001>
module attributes {stable_mosaic.version = 11 : i64} {
  func.func @_ffwd_kernel(%arg0: i32, %arg1: memref<16x384xbf16, #tpu.memory_space<vmem>>, %arg2: memref<384x1536xbf16, #tpu.memory_space<vmem>>, %arg3: memref<1x1536xf32, #tpu.memory_space<vmem>>, %arg4: memref<1536x384xbf16, #tpu.memory_space<vmem>>, %arg5: memref<1x384xf32, #tpu.memory_space<vmem>>, %arg6: memref<16x384xi32, #tpu.memory_space<vmem>>, %arg7: memref<16x384xf32, #tpu.memory_space<vmem>>) attributes {dimension_semantics = [#tpu.dimension_semantics<parallel>], iteration_bounds = array<i64: 1>, scalar_prefetch = 0 : i64, scratch_operands = 0 : i64, tpu.core_type = #tpu.core_type<tc>, window_params = [{transform_indices = @transform_0, window_bounds = array<i64: 16, 384>}, {pipeline_mode = #tpu.pipeline_mode<synchronous>, transform_indices = @transform_1, window_bounds = array<i64: 384, 1536>}, {pipeline_mode = #tpu.pipeline_mode<synchronous>, transform_indices = @transform_2, window_bounds = array<i64: 1, 1536>}, {pipeline_mode = #tpu.pipeline_mode<synchronous>, transform_indices = @transform_3, window_bounds = array<i64: 1536, 384>}, {pipeline_mode = #tpu.pipeline_mode<synchronous>, transform_indices = @transform_4, window_bounds = array<i64: 1, 384>}, {transform_indices = @transform_5, window_bounds = array<i64: 16, 384>}, {transform_indices = @transform_6, window_bounds = array<i64: 16, 384>}]} {
    %c0 = arith.constant 0 : index
    %c0_0 = arith.constant 0 : index
    %0 = vector.load %arg1[%c0, %c0_0] : memref<16x384xbf16, #tpu.memory_space<vmem>>, vector<16x384xbf16>
    %c0_1 = arith.constant 0 : index
    %c0_2 = arith.constant 0 : index
    %1 = vector.load %arg2[%c0_1, %c0_2] : memref<384x1536xbf16, #tpu.memory_space<vmem>>, vector<384x1536xbf16>
    %cst = arith.constant dense<0.000000e+00> : vector<16x1536xf32>
    %2 = tpu.matmul %0, %1, %cst {dimension_numbers = #tpu.dot_dimension_numbers<[1], [0], [0], [1], [0, 0, 1, 1], [], []>} : vector<16x384xbf16>, vector<384x1536xbf16>, vector<16x1536xf32> -> vector<16x1536xf32>
    %c0_3 = arith.constant 0 : index
    %c0_4 = arith.constant 0 : index
    %3 = vector.load %arg3[%c0_3, %c0_4] : memref<1x1536xf32, #tpu.memory_space<vmem>>, vector<1x1536xf32>
    %4 = vector.broadcast %3 : vector<1x1536xf32> to vector<16x1536xf32>
    %5 = arith.addf %2, %4 : vector<16x1536xf32>
    %cst_5 = arith.constant 0.000000e+00 : f32
    %6 = vector.broadcast %cst_5 : f32 to vector<16x1536xf32>
    %7 = arith.maximumf %5, %6 : vector<16x1536xf32>
    %8 = arith.truncf %7 : vector<16x1536xf32> to vector<16x1536xbf16>
    %c0_6 = arith.constant 0 : index
    %c0_7 = arith.constant 0 : index
    %9 = vector.load %arg4[%c0_6, %c0_7] : memref<1536x384xbf16, #tpu.memory_space<vmem>>, vector<1536x384xbf16>
    %cst_8 = arith.constant dense<0.000000e+00> : vector<16x384xf32>
    %10 = tpu.matmul %8, %9, %cst_8 {dimension_numbers = #tpu.dot_dimension_numbers<[1], [0], [0], [1], [0, 0, 1, 1], [], []>} : vector<16x1536xbf16>, vector<1536x384xbf16>, vector<16x384xf32> -> vector<16x384xf32>
    %c0_9 = arith.constant 0 : index
    %c0_10 = arith.constant 0 : index
    %11 = vector.load %arg5[%c0_9, %c0_10] : memref<1x384xf32, #tpu.memory_space<vmem>>, vector<1x384xf32>
    %12 = vector.broadcast %11 : vector<1x384xf32> to vector<16x384xf32>
    %13 = arith.addf %10, %12 : vector<16x384xf32>
    %c0_11 = arith.constant 0 : index
    %c0_12 = arith.constant 0 : index
    %14 = vector.load %arg6[%c0_11, %c0_12] : memref<16x384xi32, #tpu.memory_space<vmem>>, vector<16x384xi32>
    %c858993459_i32 = arith.constant 858993459 : i32
    %15 = vector.broadcast %c858993459_i32 : i32 to vector<16x384xi32>
    %16 = arith.cmpi uge, %14, %15 : vector<16x384xi32>
    %cst_13 = arith.constant 1.250000e+00 : f32
    %17 = vector.broadcast %cst_13 : f32 to vector<16x384xf32>
    %18 = arith.mulf %13, %17 : vector<16x384xf32>
    %cst_14 = arith.constant 0.000000e+00 : f32
    %19 = vector.broadcast %cst_14 : f32 to vector<16x384xf32>
    %20 = arith.select %16, %18, %19 : vector<16x384xi1>, vector<16x384xf32>
    %c0_15 = arith.constant 0 : index
    %c0_16 = arith.constant 0 : index
    %21 = vector.load %arg7[%c0_15, %c0_16] : memref<16x384xf32, #tpu.memory_space<vmem>>, vector<16x384xf32>
    tpu.vector_store %arg7[%c0_15, %c0_16], %20 {strides = array<i32>} : memref<16x384xf32, #tpu.memory_space<vmem>>, vector<16x384xf32>,
    return
  }
  func.func @transform_0(%arg0: i32) -> (i32, i32) {
    %c0_i32 = arith.constant 0 : i32
    %c0_i32_0 = arith.constant 0 : i32
    return %arg0, %c0_i32 : i32, i32
  }
  func.func @transform_1(%arg0: i32) -> (i32, i32) {
    %c0_i32 = arith.constant 0 : i32
    %c0_i32_0 = arith.constant 0 : i32
    %c0_i32_1 = arith.constant 0 : i32
    return %c0_i32, %c0_i32_0 : i32, i32
  }
  func.func @transform_2(%arg0: i32) -> (i32, i32) {
    %c0_i32 = arith.constant 0 : i32
    %c0_i32_0 = arith.constant 0 : i32
    %c0_i32_1 = arith.constant 0 : i32
    return %c0_i32, %c0_i32_0 : i32, i32
  }
  func.func @transform_3(%arg0: i32) -> (i32, i32) {
    %c0_i32 = arith.constant 0 : i32
    %c0_i32_0 = arith.constant 0 : i32
    %c0_i32_1 = arith.constant 0 : i32
    return %c0_i32, %c0_i32_0 : i32, i32
  }
  func.func @transform_4(%arg0: i32) -> (i32, i32) {
    %c0_i32 = arith.constant 0 : i32
    %c0_i32_0 = arith.constant 0 : i32
    %c0_i32_1 = arith.constant 0 : i32
    return %c0_i32, %c0_i32_0 : i32, i32
  }
  func.func @transform_5(%arg0: i32) -> (i32, i32) {
    %c0_i32 = arith.constant 0 : i32
    %c0_i32_0 = arith.constant 0 : i32
    return %arg0, %c0_i32 : i32, i32
  }
  func.func @transform_6(%arg0: i32) -> (i32, i32) {
    %c0_i32 = arith.constant 0 : i32
    %c0_i32_0 = arith.constant 0 : i32
    return %arg0, %c0_i32 : i32, i32
  }
}

</mosaic_0001>

<bundles_post_ra>
// kernel: tpu_custom_call.1
= control target key start
LH: loop header
LB: loop body
LE: loop exit
PB: predicated region body
PF: predicated region fallthrough
CT: control target
= control target key end

     0   :  { %11 = vsyncpa [#allocation3], 0  ;;  %s7002_s0 = inlined_call_operand.hbm [shape: bf16[16,384], index: 0, kind: input, shape index: {}]   ;;  %s7003_s1 = inlined_call_operand.hbm [shape: bf16[384,1536], index: 1, kind: input, shape index: {}]   ;;  %s7004_s2 = inlined_call_operand.hbm [shape: f32[1,1536], index: 2, kind: input, shape index: {}]   ;;  %s7005_s3 = inlined_call_operand.hbm [shape: bf16[1536,384], index: 3, kind: input, shape index: {}]   ;;  %s7006_s4 = inlined_call_operand.hbm [shape: f32[1,384], index: 4, kind: input, shape index: {}]   ;;  %s7007_s5 = inlined_call_operand.hbm [shape: u32[16,384], index: 5, kind: input, shape index: {}]   ;;  %s7008_s6 = inlined_call_operand.hbm [shape: f32[16,384], index: 6, kind: output, shape index: {}]  }
   0x1   :  { %12 = vsyncpa [#allocation6], 0 }
   0x2   :  { %13 = vsyncpa [#allocation9], 0 }
   0x3   :  { %14 = vsyncpa [#allocation12], 0 }
   0x4   :  { %15 = vsyncpa [#allocation4], 0  ;;  %s6743_s21 = smov [#allocation5]   ;;  %s6579_s25 = scalar_lea.hbm %s7003_s1, 36864 }
   0x5   :  { %s33_s22 = sshll.u32 %s6743_s21, 4  ;;  %p6580_p0 = scmp.ne.s32.totalorder %s7003_s1, %s6579_s25  ;;  %s34_s22 = int_to_ptr.vmem [resolvable:$true] %s33_s22 }
   0x6   :  { %p6583_p1 = scmp.lt.u32.totalorder %s6579_s25, %s7003_s1 }
   0x8   :  { %p6585_p2 = pnand %p6583_p1, %p6580_p0 }
   0xa   :  { %6588 = shalt.err (!%p6585_p2)
}
   0xb   :  { %s6589_s30 = scalar_lea.vmem %s34_s22, 36864  ;;  %p6594_p4 = scmp.lt.s32.totalorder %s34_s22, %s34_s22 }
   0xc   :  { %p6590_p3 = scmp.ne.s32.totalorder %s34_s22, %s6589_s30  ;;  %p6595_p5 = scmp.lt.s32.totalorder %s6589_s30, %s6589_s30 }
   0xe   :  { %p6596_p6 = por %p6595_p5, %p6594_p4 }
  0x10   :  { %p6597_p7 = pnand %p6596_p6, %p6590_p3 }
  0x12   :  { %6600 = shalt.err (!%p6597_p7)
}
  0x13   :  { %s6744_s7 = smov 768   ;;  %s6745_s8 = smov 48  }
  0x14   :  { %39 = dma.hbm_to_vmem [thread:$0]  %s7003_s1, 36864, %s34_s22, [#allocation6], %s6744_s7, %s6744_s7, %s6745_s8  }
  0x15   :  { %s6746_s11 = smov [#allocation8]   ;;  %s6747_s13 = smov [#allocation2]  }
  0x16   :  { %s55_s12 = sshll.u32 %s6746_s11, 4  ;;  %s21_s14 = sshll.u32 %s6747_s13, 4  ;;  %s56_s12 = int_to_ptr.vmem [resolvable:$true] %s55_s12  ;;  %s22_s14 = int_to_ptr.vmem [resolvable:$true] %s21_s14 }
  0x17   :  { %s6601_s17 = scalar_lea.hbm %s7005_s3, 36864 }
  0x18   :  { %p6602_p8 = scmp.ne.s32.totalorder %s7005_s3, %s6601_s17  ;;  %p6605_p9 = scmp.lt.u32.totalorder %s6601_s17, %s7005_s3 }
  0x1a   :  { %p6607_p10 = pnand %p6605_p9, %p6602_p8 }
  0x1c   :  { %6610 = shalt.err (!%p6607_p10)
}
  0x1d   :  { %s6611_s1 = scalar_lea.vmem %s56_s12, 36864  ;;  %p6616_p12 = scmp.lt.s32.totalorder %s56_s12, %s56_s12 }
  0x1e   :  { %p6612_p11 = scmp.ne.s32.totalorder %s56_s12, %s6611_s1  ;;  %p6617_p13 = scmp.lt.s32.totalorder %s6611_s1, %s6611_s1 }
  0x20   :  { %p6618_p0 = por %p6617_p13, %p6616_p12 }
  0x22   :  { %p6619_p1 = pnand %p6618_p0, %p6612_p11 }
  0x24   :  { %6622 = shalt.err (!%p6619_p1)
}
  0x25   :  { %s6748_s22 = smov 192   ;;  %s6749_s23 = smov 12  }
  0x26   :  { %61 = dma.hbm_to_vmem [thread:$0]  %s7005_s3, 36864, %s56_s12, [#allocation9], %s6748_s22, %s6748_s22, %s6749_s23  }
  0x27   :  { %s6623_s28 = scalar_lea.hbm %s7002_s0, 384 }
  0x28   :  { %p6624_p2 = scmp.ne.s32.totalorder %s7002_s0, %s6623_s28  ;;  %p6627_p3 = scmp.lt.u32.totalorder %s6623_s28, %s7002_s0 }
  0x2a   :  { %p6629_p4 = pnand %p6627_p3, %p6624_p2 }
  0x2c   :  { %6632 = shalt.err (!%p6629_p4)
}
  0x2d   :  { %s6633_s9 = scalar_lea.vmem %s22_s14, 384  ;;  %p6638_p6 = scmp.lt.s32.totalorder %s22_s14, %s22_s14 }
  0x2e   :  { %p6634_p5 = scmp.ne.s32.totalorder %s22_s14, %s6633_s9  ;;  %p6639_p7 = scmp.lt.s32.totalorder %s6633_s9, %s6633_s9 }
  0x30   :  { %p6640_p8 = por %p6639_p7, %p6638_p6 }
  0x32   :  { %p6641_p9 = pnand %p6640_p8, %p6634_p5 }
  0x34   :  { %6644 = shalt.err (!%p6641_p9)
}
  0x35   :  { %27 = dma.hbm_to_vmem [thread:$0]  %s7002_s0, 384, %s22_s14, [#allocation3], %s6748_s22, %s6748_s22, %s6749_s23  }
  0x36   :  { %s6750_s11 = smov [#allocation7]   ;;  %s6751_s13 = smov [#allocation10]  }
  0x37   :  { %s46_s12 = sshll.u32 %s6750_s11, 4  ;;  %s68_s15 = sshll.u32 %s6751_s13, 4  ;;  %s47_s12 = int_to_ptr.vmem [resolvable:$true] %s46_s12  ;;  %s69_s15 = int_to_ptr.vmem [resolvable:$true] %s68_s15 }
  0x38   :  { %s6645_s18 = scalar_lea.hbm %s7004_s2, 192 }
  0x39   :  { %p6646_p10 = scmp.ne.s32.totalorder %s7004_s2, %s6645_s18  ;;  %p6649_p11 = scmp.lt.u32.totalorder %s6645_s18, %s7004_s2 }
  0x3b   :  { %p6651_p12 = pnand %p6649_p11, %p6646_p10 }
  0x3d   :  { %6654 = shalt.err (!%p6651_p12)
}
  0x3e   :  { %s6655_s0 = scalar_lea.vmem %s47_s12, 192  ;;  %p6660_p0 = scmp.lt.s32.totalorder %s47_s12, %s47_s12 }
  0x3f   :  { %p6656_p13 = scmp.ne.s32.totalorder %s47_s12, %s6655_s0  ;;  %p6661_p1 = scmp.lt.s32.totalorder %s6655_s0, %s6655_s0 }
  0x41   :  { %p6662_p2 = por %p6661_p1, %p6660_p0 }
  0x43   :  { %p6663_p3 = pnand %p6662_p2, %p6656_p13 }
  0x45   :  { %6666 = shalt.err (!%p6663_p3)
}
  0x46   :  { %49 = dma.hbm_to_vmem [thread:$0]  %s7004_s2, 192, %s47_s12, [#allocation6]  }
  0x47   :  { %s6667_s25 = scalar_lea.hbm %s7006_s4, 48 }
  0x48   :  { %p6668_p4 = scmp.ne.s32.totalorder %s7006_s4, %s6667_s25  ;;  %p6671_p5 = scmp.lt.u32.totalorder %s6667_s25, %s7006_s4 }
  0x4a   :  { %p6673_p6 = pnand %p6671_p5, %p6668_p4 }
  0x4c   :  { %6676 = shalt.err (!%p6673_p6)
}
  0x4d   :  { %s6677_s30 = scalar_lea.vmem %s69_s15, 48  ;;  %s6681_s7 = scalar_lea.vmem %s69_s15, 64 }
  0x4e   :  { %p6678_p7 = scmp.ne.s32.totalorder %s69_s15, %s6677_s30  ;;  %p6682_p8 = scmp.lt.s32.totalorder %s69_s15, %s69_s15 }
  0x4f   :  { %p6683_p9 = scmp.lt.s32.totalorder %s6681_s7, %s6677_s30 }
  0x51   :  { %p6684_p10 = por %p6683_p9, %p6682_p8 }
  0x53   :  { %p6685_p11 = pnand %p6684_p10, %p6678_p7 }
  0x55   :  { %6688 = shalt.err (!%p6685_p11)
}
  0x56   :  { %71 = dma.hbm_to_vmem [thread:$0]  %s7006_s4, 48, %s69_s15, [#allocation9]  }
  0x57   :  { %s6752_s9 = smov [#allocation11]   ;;  %s6689_s12 = scalar_lea.hbm %s7007_s5, 768 }
  0x58   :  { %s77_s3 = sshll.u32 %s6752_s9, 4  ;;  %p6690_p12 = scmp.ne.s32.totalorder %s7007_s5, %s6689_s12  ;;  %s78_s3 = int_to_ptr.vmem [resolvable:$true] %s77_s3 }
  0x59   :  { %p6693_p13 = scmp.lt.u32.totalorder %s6689_s12, %s7007_s5 }
  0x5b   :  { %p6695_p0 = pnand %p6693_p13, %p6690_p12 }
  0x5d   :  { %6698 = shalt.err (!%p6695_p0)
}
  0x5e   :  { %s6699_s19 = scalar_lea.vmem %s78_s3, 768  ;;  %p6704_p2 = scmp.lt.s32.totalorder %s78_s3, %s78_s3 }
  0x5f   :  { %p6700_p1 = scmp.ne.s32.totalorder %s78_s3, %s6699_s19  ;;  %p6705_p3 = scmp.lt.s32.totalorder %s6699_s19, %s6699_s19 }
  0x61   :  { %p6706_p4 = por %p6705_p3, %p6704_p2 }
  0x63   :  { %p6707_p5 = pnand %p6706_p4, %p6700_p1 }
  0x65   :  { %6710 = shalt.err (!%p6707_p5)
}
  0x66   :  { %s6753_s4 = smov 384   ;;  %s6754_s15 = smov 24  }
  0x67   :  { %83 = dma.hbm_to_vmem [thread:$0]  %s7007_s5, 768, %s78_s3, [#allocation12], %s6753_s4, %s6753_s4, %s6754_s15  }
  0x68   :  { %6733 = dma.done.wait [#allocation3], 384  }
  0x69   :  { %6734 = vsyncadd [#allocation3], 4294966912 }
  0x6a   :  { %6735 = dma.done.wait [#allocation6], 37056  }
  0x6b   :  { %6736 = vsyncadd [#allocation6], 4294930240 }
  0x6c   :  { %6737 = dma.done.wait [#allocation9], 36912  }
  0x6d   :  { %6738 = vsyncadd [#allocation9], 4294930384 }
  0x6e   :  { %6739 = dma.done.wait [#allocation12], 768  }
  0x6f   :  { %6740 = vsyncadd [#allocation12], 4294966528  ;;  %v5755_v0 = vld [vmem:[#allocation5 + $0x4] ss:$48 sps:$4 sm:$0xff]   ;;  %v5757_v1 = vld [vmem:[#allocation5] ss:$48 sps:$4 sm:$0xff]  }
  0x70   :  { %1915 = vmatprep.subr.bf16.mxu1 %v5755_v0  ;;  %v5758_v2 = vld [vmem:[#allocation5 + $0x64] ss:$48 sps:$4 sm:$0xff]   ;;  %v5760_v3 = vld [vmem:[#allocation5 + $0x60] ss:$48 sps:$4 sm:$0xff]   ;;  %v6867_v18 = vld [vmem:[#allocation2 + $0x4] ss:$12 sps:$4 sm:$0xff]  }
  0x71   :  { %1916 = vmatpush1.bf16.msra.mxu1 %v5757_v1  ;;  %v5761_v4 = vld [vmem:[#allocation5 + $0xc4] ss:$48 sps:$4 sm:$0xff]   ;;  %v5763_v5 = vld [vmem:[#allocation5 + $0xc0] ss:$48 sps:$4 sm:$0xff]   ;;  %1947 = vmatprep.mubr.bf16.mxu1 %v6867_v18  ;;  %v6755_v63 = vmov 0   ;;  %s6756_s5 = smov [#allocation13]  }
  0x72   :  { %1917 = vmatprep.subr.bf16.mxu1 %v5758_v2  ;;  %v5764_v6 = vld [vmem:[#allocation5 + $0x124] ss:$48 sps:$4 sm:$0xff]   ;;  %v5766_v7 = vld [vmem:[#allocation5 + $0x120] ss:$48 sps:$4 sm:$0xff]   ;;  %2119 = vmatprep.mubr.bf16.mxu0 %v6867_v18  ;;  %s4943_s1 = sshll.u32 %s6756_s5, 4  ;;  %s4944_s1 = int_to_ptr.vmem [resolvable:$true] %s4943_s1 }
  0x73   :  { %v5767_v8 = vld [vmem:[#allocation5 + $0x184] ss:$48 sps:$4 sm:$0xff]   ;;  %v5769_v9 = vld [vmem:[#allocation5 + $0x180] ss:$48 sps:$4 sm:$0xff]   ;;  %s6711_s0 = scalar_lea.vmem %s4944_s1, 768  ;;  %p6716_p7 = scmp.lt.s32.totalorder %s4944_s1, %s4944_s1 }
  0x74   :  { %v5770_v10 = vld [vmem:[#allocation5 + $0x1e4] ss:$48 sps:$4 sm:$0xff]   ;;  %v5772_v11 = vld [vmem:[#allocation5 + $0x1e0] ss:$48 sps:$4 sm:$0xff]   ;;  %p6712_p6 = scmp.ne.s32.totalorder %s4944_s1, %s6711_s0  ;;  %p6717_p8 = scmp.lt.s32.totalorder %s6711_s0, %s6711_s0 }
  0x75   :  { %1918 = vmatpush1.bf16.msra.mxu1 %v5760_v3  ;;  %v5773_v12 = vld [vmem:[#allocation5 + $0x244] ss:$48 sps:$4 sm:$0xff]   ;;  %v5775_v14 = vld [vmem:[#allocation5 + $0x240] ss:$48 sps:$4 sm:$0xff]  }
  0x76   :  { %1919 = vmatprep.subr.bf16.mxu1 %v5761_v4  ;;  %v5800_v13 = vld [vmem:[#allocation5 + $0x14] ss:$48 sps:$4 sm:$0xff]   ;;  %v5804_v16 = vld [vmem:[#allocation5 + $0x10] ss:$48 sps:$4 sm:$0xff]   ;;  %p6718_p9 = por %p6717_p8, %p6716_p7 }
  0x77   :  { %v5776_v15 = vld [vmem:[#allocation5 + $0x2a4] ss:$48 sps:$4 sm:$0xff]   ;;  %2087 = vmatprep.subr.bf16.mxu0 %v5800_v13  ;;  %v5778_v19 = vld [vmem:[#allocation5 + $0x2a0] ss:$48 sps:$4 sm:$0xff]  }
  0x78   :  { %v5806_v17 = vld [vmem:[#allocation5 + $0x74] ss:$48 sps:$4 sm:$0xff]   ;;  %2088 = vmatpush1.bf16.msra.mxu0 %v5804_v16  ;;  %v5813_v20 = vld [vmem:[#allocation5 + $0x70] ss:$48 sps:$4 sm:$0xff]   ;;  %p6719_p10 = pnand %p6718_p9, %p6712_p6 }
  0x79   :  { %1920 = vmatpush1.bf16.msra.mxu1 %v5763_v5  ;;  %2089 = vmatprep.subr.bf16.mxu0 %v5806_v17  ;;  %v5815_v21 = vld [vmem:[#allocation5 + $0xd4] ss:$48 sps:$4 sm:$0xff]   ;;  %v5820_v23 = vld [vmem:[#allocation5 + $0xd0] ss:$48 sps:$4 sm:$0xff]  }
  0x7a   :  { %1921 = vmatprep.subr.bf16.mxu1 %v5764_v6  ;;  %v5779_v22 = vld [vmem:[#allocation5 + $0x304] ss:$48 sps:$4 sm:$0xff]   ;;  %v5781_v25 = vld [vmem:[#allocation5 + $0x300] ss:$48 sps:$4 sm:$0xff]  }
  0x7b   :  { %v5821_v24 = vld [vmem:[#allocation5 + $0x134] ss:$48 sps:$4 sm:$0xff]   ;;  %v5826_v27 = vld [vmem:[#allocation5 + $0x130] ss:$48 sps:$4 sm:$0xff]  }
  0x7c   :  { %2090 = vmatpush1.bf16.msra.mxu0 %v5813_v20  ;;  %v5782_v26 = vld [vmem:[#allocation5 + $0x364] ss:$48 sps:$4 sm:$0xff]   ;;  %v5784_v29 = vld [vmem:[#allocation5 + $0x360] ss:$48 sps:$4 sm:$0xff]  }
  0x7d   :  { %1922 = vmatpush1.bf16.msra.mxu1 %v5766_v7  ;;  %2091 = vmatprep.subr.bf16.mxu0 %v5815_v21  ;;  %v5827_v28 = vld [vmem:[#allocation5 + $0x194] ss:$48 sps:$4 sm:$0xff]   ;;  %v5832_v31 = vld [vmem:[#allocation5 + $0x190] ss:$48 sps:$4 sm:$0xff]  }
  0x7e   :  { %1923 = vmatprep.subr.bf16.mxu1 %v5767_v8  ;;  %v5785_v30 = vld [vmem:[#allocation5 + $0x3c4] ss:$48 sps:$4 sm:$0xff]   ;;  %v5787_v33 = vld [vmem:[#allocation5 + $0x3c0] ss:$48 sps:$4 sm:$0xff]  }
  0x7f   :  { %v5833_v32 = vld [vmem:[#allocation5 + $0x1f4] ss:$48 sps:$4 sm:$0xff]   ;;  %v5838_v35 = vld [vmem:[#allocation5 + $0x1f0] ss:$48 sps:$4 sm:$0xff]  }
  0x80   :  { %2092 = vmatpush1.bf16.msra.mxu0 %v5820_v23  ;;  %v5788_v34 = vld [vmem:[#allocation5 + $0x424] ss:$48 sps:$4 sm:$0xff]   ;;  %v5790_v37 = vld [vmem:[#allocation5 + $0x420] ss:$48 sps:$4 sm:$0xff]  }
  0x81   :  { %1924 = vmatpush1.bf16.msra.mxu1 %v5769_v9  ;;  %2093 = vmatprep.subr.bf16.mxu0 %v5821_v24  ;;  %v5839_v36 = vld [vmem:[#allocation5 + $0x254] ss:$48 sps:$4 sm:$0xff]   ;;  %v5844_v39 = vld [vmem:[#allocation5 + $0x250] ss:$48 sps:$4 sm:$0xff]  }
  0x82   :  { %1925 = vmatprep.subr.bf16.mxu1 %v5770_v10  ;;  %v5791_v38 = vld [vmem:[#allocation5 + $0x484] ss:$48 sps:$4 sm:$0xff]   ;;  %v5793_v41 = vld [vmem:[#allocation5 + $0x480] ss:$48 sps:$4 sm:$0xff]  }
  0x83   :  { %v5845_v40 = vld [vmem:[#allocation5 + $0x2b4] ss:$48 sps:$4 sm:$0xff]   ;;  %v5850_v43 = vld [vmem:[#allocation5 + $0x2b0] ss:$48 sps:$4 sm:$0xff]  }
  0x84   :  { %2094 = vmatpush1.bf16.msra.mxu0 %v5826_v27  ;;  %v5794_v42 = vld [vmem:[#allocation5 + $0x4e4] ss:$48 sps:$4 sm:$0xff]   ;;  %v5796_v45 = vld [vmem:[#allocation5 + $0x4e0] ss:$48 sps:$4 sm:$0xff]  }
  0x85   :  { %1926 = vmatpush1.bf16.msra.mxu1 %v5772_v11  ;;  %2095 = vmatprep.subr.bf16.mxu0 %v5827_v28  ;;  %v5851_v44 = vld [vmem:[#allocation5 + $0x314] ss:$48 sps:$4 sm:$0xff]   ;;  %v5856_v47 = vld [vmem:[#allocation5 + $0x310] ss:$48 sps:$4 sm:$0xff]  }
  0x86   :  { %1927 = vmatprep.subr.bf16.mxu1 %v5773_v12  ;;  %v5797_v46 = vld [vmem:[#allocation5 + $0x544] ss:$48 sps:$4 sm:$0xff]   ;;  %v5799_v49 = vld [vmem:[#allocation5 + $0x540] ss:$48 sps:$4 sm:$0xff]  }
  0x87   :  { %v5857_v48 = vld [vmem:[#allocation5 + $0x374] ss:$48 sps:$4 sm:$0xff]   ;;  %v5863_v51 = vld [vmem:[#allocation5 + $0x370] ss:$48 sps:$4 sm:$0xff]  }
  0x88   :  { %2096 = vmatpush1.bf16.msra.mxu0 %v5832_v31  ;;  %v5802_v50 = vld [vmem:[#allocation5 + $0x5a4] ss:$48 sps:$4 sm:$0xff]   ;;  %v5805_v53 = vld [vmem:[#allocation5 + $0x5a0] ss:$48 sps:$4 sm:$0xff]  }
  0x89   :  { %1928 = vmatpush1.bf16.msra.mxu1 %v5775_v14  ;;  %2097 = vmatprep.subr.bf16.mxu0 %v5833_v32  ;;  %v5864_v52 = vld [vmem:[#allocation5 + $0x3d4] ss:$48 sps:$4 sm:$0xff]   ;;  %v5869_v55 = vld [vmem:[#allocation5 + $0x3d0] ss:$48 sps:$4 sm:$0xff]  }
  0x8a   :  { %1929 = vmatprep.subr.bf16.mxu1 %v5776_v15  ;;  %v5812_v54 = vld [vmem:[#allocation5 + $0x604] ss:$48 sps:$4 sm:$0xff]   ;;  %v5810_v58 = vld [vmem:[#allocation5 + $0x600] ss:$48 sps:$4 sm:$0xff]  }
  0x8b   :  { %v5870_v56 = vld [vmem:[#allocation5 + $0x434] ss:$48 sps:$4 sm:$0xff]   ;;  %v5875_v60 = vld [vmem:[#allocation5 + $0x430] ss:$48 sps:$4 sm:$0xff]  }
  0x8c   :  { %2098 = vmatpush1.bf16.msra.mxu0 %v5838_v35  ;;  %v6871_v57 = vld [vmem:[#allocation2] ss:$12 sps:$4 sm:$0xff]   ;;  %v5817_v62 = vld [vmem:[#allocation5 + $0x660] ss:$48 sps:$4 sm:$0xff]  }
  0x8d   :  { %1930 = vmatpush1.bf16.msra.mxu1 %v5778_v19  ;;  %2099 = vmatprep.subr.bf16.mxu0 %v5839_v36  ;;  %v5819_v59 = vld [vmem:[#allocation5 + $0x664] ss:$48 sps:$4 sm:$0xff]   ;;  %v5881_v1 = vld [vmem:[#allocation5 + $0x490] ss:$48 sps:$4 sm:$0xff]  }
  0x8e   :  { %1931 = vmatprep.subr.bf16.mxu1 %v5779_v22  ;;  %v5876_v61 = vld [vmem:[#allocation5 + $0x494] ss:$48 sps:$4 sm:$0xff]   ;;  %v5823_v3 = vld [vmem:[#allocation5 + $0x6c0] ss:$48 sps:$4 sm:$0xff]  }
  0x8f   :  { %v5825_v0 = vld [vmem:[#allocation5 + $0x6c4] ss:$48 sps:$4 sm:$0xff]   ;;  %v5887_v5 = vld [vmem:[#allocation5 + $0x4f0] ss:$48 sps:$4 sm:$0xff]  }
  0x90   :  { %2100 = vmatpush1.bf16.msra.mxu0 %v5844_v39  ;;  %v5882_v2 = vld [vmem:[#allocation5 + $0x4f4] ss:$48 sps:$4 sm:$0xff]   ;;  %v5829_v7 = vld [vmem:[#allocation5 + $0x720] ss:$48 sps:$4 sm:$0xff]  }
  0x91   :  { %1932 = vmatpush1.bf16.msra.mxu1 %v5781_v25  ;;  %2101 = vmatprep.subr.bf16.mxu0 %v5845_v40  ;;  %v5831_v4 = vld [vmem:[#allocation5 + $0x724] ss:$48 sps:$4 sm:$0xff]   ;;  %v5893_v9 = vld [vmem:[#allocation5 + $0x550] ss:$48 sps:$4 sm:$0xff]   ;;  %v5862_v25 = vld [vmem:[#allocation5 + $0xc] ss:$48 sps:$4 sm:$0xff]  }
  0x92   :  { %1933 = vmatprep.subr.bf16.mxu1 %v5782_v26  ;;  %v5888_v6 = vld [vmem:[#allocation5 + $0x554] ss:$48 sps:$4 sm:$0xff]   ;;  %v5835_v11 = vld [vmem:[#allocation5 + $0x780] ss:$48 sps:$4 sm:$0xff]  }
  0x93   :  { %v5837_v8 = vld [vmem:[#allocation5 + $0x784] ss:$48 sps:$4 sm:$0xff]   ;;  %v5899_v13 = vld [vmem:[#allocation5 + $0x5b0] ss:$48 sps:$4 sm:$0xff]  }
  0x94   :  { %2102 = vmatpush1.bf16.msra.mxu0 %v5850_v43  ;;  %v5894_v10 = vld [vmem:[#allocation5 + $0x5b4] ss:$48 sps:$4 sm:$0xff]   ;;  %v5841_v15 = vld [vmem:[#allocation5 + $0x7e0] ss:$48 sps:$4 sm:$0xff]  }
  0x95   :  { %1934 = vmatpush1.bf16.msra.mxu1 %v5784_v29  ;;  %2103 = vmatprep.subr.bf16.mxu0 %v5851_v44  ;;  %v5843_v12 = vld [vmem:[#allocation5 + $0x7e4] ss:$48 sps:$4 sm:$0xff]   ;;  %v5900_v17 = vld [vmem:[#allocation5 + $0x610] ss:$48 sps:$4 sm:$0xff]   ;;  %v5860_v29 = vld [vmem:[#allocation5 + $0x8] ss:$48 sps:$4 sm:$0xff]  }
  0x96   :  { %1935 = vmatprep.subr.bf16.mxu1 %v5785_v30  ;;  %v5902_v14 = vld [vmem:[#allocation5 + $0x614] ss:$48 sps:$4 sm:$0xff]   ;;  %v5847_v20 = vld [vmem:[#allocation5 + $0x840] ss:$48 sps:$4 sm:$0xff]   ;;  %v5868_v30 = vld [vmem:[#allocation5 + $0x6c] ss:$48 sps:$4 sm:$0xff]  }
  0x97   :  { %v5849_v16 = vld [vmem:[#allocation5 + $0x844] ss:$48 sps:$4 sm:$0xff]   ;;  %v5906_v22 = vld [vmem:[#allocation5 + $0x670] ss:$48 sps:$4 sm:$0xff]  }
  0x98   :  { %2104 = vmatpush1.bf16.msra.mxu0 %v5856_v47  ;;  %v5908_v19 = vld [vmem:[#allocation5 + $0x674] ss:$48 sps:$4 sm:$0xff]   ;;  %v5853_v24 = vld [vmem:[#allocation5 + $0x8a0] ss:$48 sps:$4 sm:$0xff]  }
  0x99   :  { %1936 = vmatpush1.bf16.msra.mxu1 %v5787_v33  ;;  %2105 = vmatprep.subr.bf16.mxu0 %v5857_v48  ;;  %v5855_v21 = vld [vmem:[#allocation5 + $0x8a4] ss:$48 sps:$4 sm:$0xff]   ;;  %v5912_v26 = vld [vmem:[#allocation5 + $0x6d0] ss:$48 sps:$4 sm:$0xff]   ;;  %v5866_v33 = vld [vmem:[#allocation5 + $0x68] ss:$48 sps:$4 sm:$0xff]  }
  0x9a   :  { %1937 = vmatprep.subr.bf16.mxu1 %v5788_v34  ;;  %v5914_v23 = vld [vmem:[#allocation5 + $0x6d4] ss:$48 sps:$4 sm:$0xff]   ;;  %v6877_v28 = vld [vmem:[#allocation2 + $0x8] ss:$12 sps:$4 sm:$0xff]  }
  0x9b   :  { %v5920_v27 = vld [vmem:[#allocation5 + $0x734] ss:$48 sps:$4 sm:$0xff]   ;;  %v5918_v31 = vld [vmem:[#allocation5 + $0x730] ss:$48 sps:$4 sm:$0xff]   ;;  %v5874_v34 = vld [vmem:[#allocation5 + $0xcc] ss:$48 sps:$4 sm:$0xff]  }
  0x9c   :  { %2106 = vmatpush1.bf16.msra.mxu0 %v5863_v51  ;;  %v5926_v32 = vld [vmem:[#allocation5 + $0x794] ss:$48 sps:$4 sm:$0xff]   ;;  %v5924_v35 = vld [vmem:[#allocation5 + $0x790] ss:$48 sps:$4 sm:$0xff]  }
  0x9d   :  { %1938 = vmatpush1.bf16.msra.mxu1 %v5790_v37  ;;  %2107 = vmatprep.subr.bf16.mxu0 %v5864_v52  ;;  %v5932_v36 = vld [vmem:[#allocation5 + $0x7f4] ss:$48 sps:$4 sm:$0xff]   ;;  %v5872_v37 = vld [vmem:[#allocation5 + $0xc8] ss:$48 sps:$4 sm:$0xff]   ;;  %v5930_v39 = vld [vmem:[#allocation5 + $0x7f0] ss:$48 sps:$4 sm:$0xff]  }
  0x9e   :  { %1939 = vmatprep.subr.bf16.mxu1 %v5791_v38  ;;  %v5880_v38 = vld [vmem:[#allocation5 + $0x12c] ss:$48 sps:$4 sm:$0xff]   ;;  %v5938_v40 = vld [vmem:[#allocation5 + $0x854] ss:$48 sps:$4 sm:$0xff]   ;;  %v5936_v43 = vld [vmem:[#allocation5 + $0x850] ss:$48 sps:$4 sm:$0xff]  }
  0x9f   :  { %v5944_v44 = vld [vmem:[#allocation5 + $0x8b4] ss:$48 sps:$4 sm:$0xff]   ;;  %v5942_v47 = vld [vmem:[#allocation5 + $0x8b0] ss:$48 sps:$4 sm:$0xff]  }
  0xa0   :  { %2108 = vmatpush1.bf16.msra.mxu0 %v5869_v55  ;;  %v5950_v48 = vld [vmem:[#allocation5 + $0x24] ss:$48 sps:$4 sm:$0xff]   ;;  %v5948_v51 = vld [vmem:[#allocation5 + $0x20] ss:$48 sps:$4 sm:$0xff]  }
  0xa1   :  { %1940 = vmatpush1.bf16.msra.mxu1 %v5793_v41  ;;  %2109 = vmatprep.subr.bf16.mxu0 %v5870_v56  ;;  %v5878_v41 = vld [vmem:[#allocation5 + $0x128] ss:$48 sps:$4 sm:$0xff]   ;;  %v5956_v52 = vld [vmem:[#allocation5 + $0x84] ss:$48 sps:$4 sm:$0xff]   ;;  %v5954_v55 = vld [vmem:[#allocation5 + $0x80] ss:$48 sps:$4 sm:$0xff]  }
  0xa2   :  { %1941 = vmatprep.subr.bf16.mxu1 %v5794_v42  ;;  %v5886_v42 = vld [vmem:[#allocation5 + $0x18c] ss:$48 sps:$4 sm:$0xff]   ;;  %v5962_v56 = vld [vmem:[#allocation5 + $0xe4] ss:$48 sps:$4 sm:$0xff]  }
  0xa4   :  { %2110 = vmatpush1.bf16.msra.mxu0 %v5875_v60  ;;  %v5960_v60 = vld [vmem:[#allocation5 + $0xe0] ss:$48 sps:$4 sm:$0xff]  }
  0xa5   :  { %1942 = vmatpush1.bf16.msra.mxu1 %v5796_v45  ;;  %2111 = vmatprep.subr.bf16.mxu0 %v5876_v61  ;;  %v5884_v45 = vld [vmem:[#allocation5 + $0x188] ss:$48 sps:$4 sm:$0xff]   ;;  %v5968_v61 = vld [vmem:[#allocation5 + $0x144] ss:$48 sps:$4 sm:$0xff]  }
  0xa6   :  { %1943 = vmatprep.subr.bf16.mxu1 %v5797_v46  ;;  %v5892_v46 = vld [vmem:[#allocation5 + $0x1ec] ss:$48 sps:$4 sm:$0xff]  }
  0xa8   :  { %2112 = vmatpush1.bf16.msra.mxu0 %v5881_v1  ;;  %v5966_v1 = vld [vmem:[#allocation5 + $0x140] ss:$48 sps:$4 sm:$0xff]  }
  0xa9   :  { %1944 = vmatpush1.bf16.msra.mxu1 %v5799_v49  ;;  %2113 = vmatprep.subr.bf16.mxu0 %v5882_v2  ;;  %v5890_v49 = vld [vmem:[#allocation5 + $0x1e8] ss:$48 sps:$4 sm:$0xff]   ;;  %v5974_v2 = vld [vmem:[#allocation5 + $0x1a4] ss:$48 sps:$4 sm:$0xff]  }
  0xaa   :  { %1945 = vmatprep.subr.bf16.mxu1 %v5802_v50  ;;  %v5898_v50 = vld [vmem:[#allocation5 + $0x24c] ss:$48 sps:$4 sm:$0xff]  }
  0xac   :  { %2114 = vmatpush1.bf16.msra.mxu0 %v5887_v5  ;;  %v5980_v5 = vld [vmem:[#allocation5 + $0x204] ss:$48 sps:$4 sm:$0xff]  }
  0xad   :  { %1946 = vmatpush1.bf16.msra.mxu1 %v5805_v53  ;;  %2115 = vmatprep.subr.bf16.mxu0 %v5888_v6  ;;  %v5896_v53 = vld [vmem:[#allocation5 + $0x248] ss:$48 sps:$4 sm:$0xff]  }
  0xae   :  { %1958 = vmatprep.subr.bf16.mxu1 %v5812_v54  ;;  %v5905_v54 = vld [vmem:[#allocation5 + $0x2ac] ss:$48 sps:$4 sm:$0xff]   ;;  %v5921_v6 = vld [vmem:[#allocation5 + $0x3c8] ss:$48 sps:$4 sm:$0xff]  }
  0xb0   :  { %1948 = vmatmul.mubr.bf16.vlgmr.msra.gmra.mrb[0].mxu1 %v6871_v57  ;;  %2116 = vmatpush1.bf16.msra.mxu0 %v5893_v9  ;;  %v5986_v9 = vld [vmem:[#allocation5 + $0x264] ss:$48 sps:$4 sm:$0xff]  }
  0xb1   :  { %1959 = vmatpush1.bf16.msra.mxu1 %v5810_v58  ;;  %1990 = vmatprep.mubr.bf16.mxu1 %v6755_v63  ;;  %v5903_v58 = vld [vmem:[#allocation5 + $0x2a8] ss:$48 sps:$4 sm:$0xff]  }
  0xb2   :  { %1960 = vmatprep.subr.bf16.mxu1 %v5819_v59  ;;  %2117 = vmatprep.subr.bf16.mxu0 %v5894_v10  ;;  %v5911_v59 = vld [vmem:[#allocation5 + $0x30c] ss:$48 sps:$4 sm:$0xff]   ;;  %v5927_v10 = vld [vmem:[#allocation5 + $0x428] ss:$48 sps:$4 sm:$0xff]  }
  0xb4   :  { %2118 = vmatpush1.bf16.msra.mxu0 %v5899_v13  ;;  %v5992_v13 = vld [vmem:[#allocation5 + $0x2c4] ss:$48 sps:$4 sm:$0xff]  }
  0xb5   :  { %1961 = vmatpush1.bf16.msra.mxu1 %v5817_v62  ;;  %2130 = vmatprep.subr.bf16.mxu0 %v5902_v14  ;;  %v5909_v62 = vld [vmem:[#allocation5 + $0x308] ss:$48 sps:$4 sm:$0xff]  }
  0xb6   :  { %1962 = vmatprep.subr.bf16.mxu1 %v5825_v0  ;;  %v5917_v0 = vld [vmem:[#allocation5 + $0x36c] ss:$48 sps:$4 sm:$0xff]   ;;  %v5933_v14 = vld [vmem:[#allocation5 + $0x488] ss:$48 sps:$4 sm:$0xff]  }
  0xb7   :  { %2120 = vmatmul.mubr.bf16.vlgmr.msra.gmra.mrb[0].mxu0 %v6871_v57 }
  0xb8   :  { %2131 = vmatpush1.bf16.msra.mxu0 %v5900_v17  ;;  %2162 = vmatprep.mubr.bf16.mxu0 %v6755_v63  ;;  %v5998_v17 = vld [vmem:[#allocation5 + $0x324] ss:$48 sps:$4 sm:$0xff]  }
  0xb9   :  { %1963 = vmatpush1.bf16.msra.mxu1 %v5823_v3  ;;  %2132 = vmatprep.subr.bf16.mxu0 %v5908_v19  ;;  %v5915_v3 = vld [vmem:[#allocation5 + $0x368] ss:$48 sps:$4 sm:$0xff]  }
  0xba   :  { %1964 = vmatprep.subr.bf16.mxu1 %v5831_v4  ;;  %v5972_v4 = vld [vmem:[#allocation5 + $0x1a0] ss:$48 sps:$4 sm:$0xff]   ;;  %v5939_v19 = vld [vmem:[#allocation5 + $0x4e8] ss:$48 sps:$4 sm:$0xff]  }
  0xbc   :  { %2133 = vmatpush1.bf16.msra.mxu0 %v5906_v22  ;;  %v6004_v22 = vld [vmem:[#allocation5 + $0x384] ss:$48 sps:$4 sm:$0xff]  }
  0xbd   :  { %1965 = vmatpush1.bf16.msra.mxu1 %v5829_v7  ;;  %2134 = vmatprep.subr.bf16.mxu0 %v5914_v23  ;;  %v5929_v7 = vld [vmem:[#allocation5 + $0x42c] ss:$48 sps:$4 sm:$0xff]   ;;  %v5945_v23 = vld [vmem:[#allocation5 + $0x548] ss:$48 sps:$4 sm:$0xff]  }
  0xbe   :  { %1966 = vmatprep.subr.bf16.mxu1 %v5837_v8  ;;  %v5978_v8 = vld [vmem:[#allocation5 + $0x200] ss:$48 sps:$4 sm:$0xff]  }
  0xc0   :  { %2135 = vmatpush1.bf16.msra.mxu0 %v5912_v26  ;;  %v6010_v26 = vld [vmem:[#allocation5 + $0x3e4] ss:$48 sps:$4 sm:$0xff]  }
  0xc1   :  { %1967 = vmatpush1.bf16.msra.mxu1 %v5835_v11  ;;  %2136 = vmatprep.subr.bf16.mxu0 %v5920_v27  ;;  %v5935_v11 = vld [vmem:[#allocation5 + $0x48c] ss:$48 sps:$4 sm:$0xff]   ;;  %v5951_v27 = vld [vmem:[#allocation5 + $0x5a8] ss:$48 sps:$4 sm:$0xff]  }
  0xc2   :  { %1968 = vmatprep.subr.bf16.mxu1 %v5843_v12  ;;  %v5984_v12 = vld [vmem:[#allocation5 + $0x260] ss:$48 sps:$4 sm:$0xff]  }
  0xc4   :  { %2137 = vmatpush1.bf16.msra.mxu0 %v5918_v31  ;;  %v6016_v31 = vld [vmem:[#allocation5 + $0x444] ss:$48 sps:$4 sm:$0xff]  }
  0xc5   :  { %1969 = vmatpush1.bf16.msra.mxu1 %v5841_v15  ;;  %2138 = vmatprep.subr.bf16.mxu0 %v5926_v32  ;;  %v5941_v15 = vld [vmem:[#allocation5 + $0x4ec] ss:$48 sps:$4 sm:$0xff]   ;;  %v5957_v32 = vld [vmem:[#allocation5 + $0x608] ss:$48 sps:$4 sm:$0xff]  }
  0xc6   :  { %1970 = vmatprep.subr.bf16.mxu1 %v5849_v16  ;;  %v5990_v16 = vld [vmem:[#allocation5 + $0x2c0] ss:$48 sps:$4 sm:$0xff]  }
  0xc8   :  { %2139 = vmatpush1.bf16.msra.mxu0 %v5924_v35  ;;  %v6022_v35 = vld [vmem:[#allocation5 + $0x4a4] ss:$48 sps:$4 sm:$0xff]  }
  0xc9   :  { %1971 = vmatpush1.bf16.msra.mxu1 %v5847_v20  ;;  %2140 = vmatprep.subr.bf16.mxu0 %v5932_v36  ;;  %v5947_v20 = vld [vmem:[#allocation5 + $0x54c] ss:$48 sps:$4 sm:$0xff]   ;;  %v5963_v36 = vld [vmem:[#allocation5 + $0x668] ss:$48 sps:$4 sm:$0xff]  }
  0xca   :  { %1972 = vmatprep.subr.bf16.mxu1 %v5855_v21  ;;  %v5996_v21 = vld [vmem:[#allocation5 + $0x320] ss:$48 sps:$4 sm:$0xff]  }
  0xcc   :  { %2141 = vmatpush1.bf16.msra.mxu0 %v5930_v39  ;;  %v6028_v39 = vld [vmem:[#allocation5 + $0x504] ss:$48 sps:$4 sm:$0xff]  }
  0xcd   :  { %1973 = vmatpush1.bf16.msra.mxu1 %v5853_v24  ;;  %2142 = vmatprep.subr.bf16.mxu0 %v5938_v40  ;;  %v5953_v24 = vld [vmem:[#allocation5 + $0x5ac] ss:$48 sps:$4 sm:$0xff]   ;;  %v5969_v40 = vld [vmem:[#allocation5 + $0x6c8] ss:$48 sps:$4 sm:$0xff]  }
  0xce   :  { %2001 = vmatprep.subr.bf16.mxu1 %v5862_v25  ;;  %v6002_v25 = vld [vmem:[#allocation5 + $0x380] ss:$48 sps:$4 sm:$0xff]  }
  0xd0   :  { %1991 = vmatmul.mubr.bf16.vlgmr.msra.gmra.mrb[0].mxu1 %v6877_v28  ;;  %2143 = vmatpush1.bf16.msra.mxu0 %v5936_v43  ;;  %v6034_v43 = vld [vmem:[#allocation5 + $0x564] ss:$48 sps:$4 sm:$0xff]  }
  0xd1   :  { %2002 = vmatpush1.bf16.msra.mxu1 %v5860_v29  ;;  %2033 = vmatprep.mubr.bf16.mxu1 %v6867_v18  ;;  %v5959_v29 = vld [vmem:[#allocation5 + $0x60c] ss:$48 sps:$4 sm:$0xff]  }
  0xd2   :  { %2003 = vmatprep.subr.bf16.mxu1 %v5868_v30  ;;  %2144 = vmatprep.subr.bf16.mxu0 %v5944_v44  ;;  %v6008_v30 = vld [vmem:[#allocation5 + $0x3e0] ss:$48 sps:$4 sm:$0xff]   ;;  %v5975_v44 = vld [vmem:[#allocation5 + $0x728] ss:$48 sps:$4 sm:$0xff]  }
  0xd4   :  { %2145 = vmatpush1.bf16.msra.mxu0 %v5942_v47  ;;  %v6040_v47 = vld [vmem:[#allocation5 + $0x5c4] ss:$48 sps:$4 sm:$0xff]  }
  0xd5   :  { %2004 = vmatpush1.bf16.msra.mxu1 %v5866_v33  ;;  %2259 = vmatprep.subr.bf16.mxu0 %v5950_v48  ;;  %v5965_v33 = vld [vmem:[#allocation5 + $0x66c] ss:$48 sps:$4 sm:$0xff]   ;;  %v5981_v48 = vld [vmem:[#allocation5 + $0x788] ss:$48 sps:$4 sm:$0xff]  }
  0xd6   :  { %2005 = vmatprep.subr.bf16.mxu1 %v5874_v34  ;;  %v6014_v34 = vld [vmem:[#allocation5 + $0x440] ss:$48 sps:$4 sm:$0xff]  }
  0xd7   :  { %2163 = vmatmul.mubr.bf16.vlgmr.msra.gmra.mrb[0].mxu0 %v6877_v28 }
  0xd8   :  { %2260 = vmatpush1.bf16.msra.mxu0 %v5948_v51  ;;  %2291 = vmatprep.mubr.bf16.mxu0 %v6867_v18  ;;  %v5923_v18 = vld [vmem:[#allocation5 + $0x3cc] ss:$48 sps:$4 sm:$0xff]   ;;  %v6046_v51 = vld [vmem:[#allocation5 + $0x624] ss:$48 sps:$4 sm:$0xff]  }
  0xd9   :  { %2006 = vmatpush1.bf16.msra.mxu1 %v5872_v37  ;;  %2261 = vmatprep.subr.bf16.mxu0 %v5956_v52  ;;  %v5971_v37 = vld [vmem:[#allocation5 + $0x6cc] ss:$48 sps:$4 sm:$0xff]   ;;  %v5987_v52 = vld [vmem:[#allocation5 + $0x7e8] ss:$48 sps:$4 sm:$0xff]  }
  0xda   :  { %2007 = vmatprep.subr.bf16.mxu1 %v5880_v38  ;;  %v6020_v38 = vld [vmem:[#allocation5 + $0x4a0] ss:$48 sps:$4 sm:$0xff]  }
  0xdc   :  { %2262 = vmatpush1.bf16.msra.mxu0 %v5954_v55  ;;  %v6052_v55 = vld [vmem:[#allocation5 + $0x684] ss:$48 sps:$4 sm:$0xff]  }
  0xdd   :  { %2008 = vmatpush1.bf16.msra.mxu1 %v5878_v41  ;;  %2263 = vmatprep.subr.bf16.mxu0 %v5962_v56  ;;  %v5977_v41 = vld [vmem:[#allocation5 + $0x72c] ss:$48 sps:$4 sm:$0xff]   ;;  %v5993_v56 = vld [vmem:[#allocation5 + $0x848] ss:$48 sps:$4 sm:$0xff]  }
  0xde   :  { %2009 = vmatprep.subr.bf16.mxu1 %v5886_v42  ;;  %v6026_v42 = vld [vmem:[#allocation5 + $0x500] ss:$48 sps:$4 sm:$0xff]  }
  0xe0   :  { %2264 = vmatpush1.bf16.msra.mxu0 %v5960_v60  ;;  %v6058_v60 = vld [vmem:[#allocation5 + $0x6e4] ss:$48 sps:$4 sm:$0xff]  }
  0xe1   :  { %2010 = vmatpush1.bf16.msra.mxu1 %v5884_v45  ;;  %2265 = vmatprep.subr.bf16.mxu0 %v5968_v61  ;;  %v5983_v45 = vld [vmem:[#allocation5 + $0x78c] ss:$48 sps:$4 sm:$0xff]   ;;  %v5999_v61 = vld [vmem:[#allocation5 + $0x8a8] ss:$48 sps:$4 sm:$0xff]  }
  0xe2   :  { %2011 = vmatprep.subr.bf16.mxu1 %v5892_v46  ;;  %v6032_v46 = vld [vmem:[#allocation5 + $0x560] ss:$48 sps:$4 sm:$0xff]  }
  0xe4   :  { %2266 = vmatpush1.bf16.msra.mxu0 %v5966_v1  ;;  %v6064_v1 = vld [vmem:[#allocation5 + $0x744] ss:$48 sps:$4 sm:$0xff]  }
  0xe5   :  { %2012 = vmatpush1.bf16.msra.mxu1 %v5890_v49  ;;  %2267 = vmatprep.subr.bf16.mxu0 %v5974_v2  ;;  %v5989_v49 = vld [vmem:[#allocation5 + $0x7ec] ss:$48 sps:$4 sm:$0xff]   ;;  %v6005_v2 = vld [vmem:[#allocation5 + $0x18] ss:$48 sps:$4 sm:$0xff]  }
  0xe6   :  { %2013 = vmatprep.subr.bf16.mxu1 %v5898_v50  ;;  %v6038_v50 = vld [vmem:[#allocation5 + $0x5c0] ss:$48 sps:$4 sm:$0xff]  }
  0xe8   :  { %2268 = vmatpush1.bf16.msra.mxu0 %v5972_v4  ;;  %v6011_v4 = vld [vmem:[#allocation5 + $0x78] ss:$48 sps:$4 sm:$0xff]  }
  0xe9   :  { %2014 = vmatpush1.bf16.msra.mxu1 %v5896_v53  ;;  %2269 = vmatprep.subr.bf16.mxu0 %v5980_v5  ;;  %v5995_v53 = vld [vmem:[#allocation5 + $0x84c] ss:$48 sps:$4 sm:$0xff]  }
  0xea   :  { %2015 = vmatprep.subr.bf16.mxu1 %v5905_v54  ;;  %v6044_v54 = vld [vmem:[#allocation5 + $0x620] ss:$48 sps:$4 sm:$0xff]   ;;  %v6019_v5 = vld [vmem:[#allocation5 + $0xdc] ss:$48 sps:$4 sm:$0xff]  }
  0xec   :  { %2270 = vmatpush1.bf16.msra.mxu0 %v5978_v8  ;;  %v6017_v8 = vld [vmem:[#allocation5 + $0xd8] ss:$48 sps:$4 sm:$0xff]  }
  0xed   :  { %2016 = vmatpush1.bf16.msra.mxu1 %v5903_v58  ;;  %2271 = vmatprep.subr.bf16.mxu0 %v5986_v9  ;;  %v6001_v58 = vld [vmem:[#allocation5 + $0x8ac] ss:$48 sps:$4 sm:$0xff]   ;;  %v6076_v9 = vld [vmem:[#allocation5 + $0x804] ss:$48 sps:$4 sm:$0xff]  }
  0xee   :  { %2017 = vmatprep.subr.bf16.mxu1 %v5911_v59  ;;  %v6050_v59 = vld [vmem:[#allocation5 + $0x680] ss:$48 sps:$4 sm:$0xff]  }
  0xf0   :  { %2272 = vmatpush1.bf16.msra.mxu0 %v5984_v12  ;;  %v6082_v12 = vld [vmem:[#allocation5 + $0x864] ss:$48 sps:$4 sm:$0xff]  }
  0xf1   :  { %2018 = vmatpush1.bf16.msra.mxu1 %v5909_v62  ;;  %2273 = vmatprep.subr.bf16.mxu0 %v5992_v13  ;;  %v6007_v62 = vld [vmem:[#allocation5 + $0x1c] ss:$48 sps:$4 sm:$0xff]   ;;  %v6023_v13 = vld [vmem:[#allocation5 + $0x138] ss:$48 sps:$4 sm:$0xff]  }
  0xf2   :  { %2019 = vmatprep.subr.bf16.mxu1 %v5917_v0  ;;  %v6056_v0 = vld [vmem:[#allocation5 + $0x6e0] ss:$48 sps:$4 sm:$0xff]  }
  0xf4   :  { %2274 = vmatpush1.bf16.msra.mxu0 %v5990_v16  ;;  %v6088_v16 = vld [vmem:[#allocation5 + $0x8c4] ss:$48 sps:$4 sm:$0xff]  }
  0xf5   :  { %2020 = vmatpush1.bf16.msra.mxu1 %v5915_v3  ;;  %2275 = vmatprep.subr.bf16.mxu0 %v5998_v17  ;;  %v6013_v3 = vld [vmem:[#allocation5 + $0x7c] ss:$48 sps:$4 sm:$0xff]   ;;  %v6029_v17 = vld [vmem:[#allocation5 + $0x198] ss:$48 sps:$4 sm:$0xff]  }
  0xf6   :  { %2021 = vmatprep.subr.bf16.mxu1 %v5923_v18  ;;  %v6070_v18 = vld [vmem:[#allocation5 + $0x7a4] ss:$48 sps:$4 sm:$0xff]  }
  0xf8   :  { %2276 = vmatpush1.bf16.msra.mxu0 %v5996_v21  ;;  %v6097_v21 = vld [vmem:[#allocation8 + $0x4] ss:$12 sps:$4 sm:$0xff]  }
  0xf9   :  { %2022 = vmatpush1.bf16.msra.mxu1 %v5921_v6  ;;  %2277 = vmatprep.subr.bf16.mxu0 %v6004_v22  ;;  %v6888_v6 = vld [vmem:[#allocation2 + $0x4] ss:$12 sps:$4 sm:$0xff]  }
  0xfa   :  { %2023 = vmatprep.subr.bf16.mxu1 %v5929_v7  ;;  %v6068_v7 = vld [vmem:[#allocation5 + $0x7a0] ss:$48 sps:$4 sm:$0xff]   ;;  %v6035_v22 = vld [vmem:[#allocation5 + $0x1f8] ss:$48 sps:$4 sm:$0xff]  }
  0xfc   :  { %2278 = vmatpush1.bf16.msra.mxu0 %v6002_v25  ;;  %v6103_v25 = vld [vmem:[#allocation8 + $0x1c] ss:$12 sps:$4 sm:$0xff]  }
  0xfd   :  { %2024 = vmatpush1.bf16.msra.mxu1 %v5927_v10  ;;  %2279 = vmatprep.subr.bf16.mxu0 %v6010_v26  ;;  %v6025_v10 = vld [vmem:[#allocation5 + $0x13c] ss:$48 sps:$4 sm:$0xff]   ;;  %v6041_v26 = vld [vmem:[#allocation5 + $0x258] ss:$48 sps:$4 sm:$0xff]  }
  0xfe   :  { %2025 = vmatprep.subr.bf16.mxu1 %v5935_v11  ;;  %v6074_v11 = vld [vmem:[#allocation5 + $0x800] ss:$48 sps:$4 sm:$0xff]  }
 0x100   :  { %2280 = vmatpush1.bf16.msra.mxu0 %v6008_v30  ;;  %v6109_v30 = vld [vmem:[#allocation8 + $0x34] ss:$12 sps:$4 sm:$0xff]  }
 0x101   :  { %2026 = vmatpush1.bf16.msra.mxu1 %v5933_v14  ;;  %2281 = vmatprep.subr.bf16.mxu0 %v6016_v31  ;;  %v6031_v14 = vld [vmem:[#allocation5 + $0x19c] ss:$48 sps:$4 sm:$0xff]   ;;  %v6047_v31 = vld [vmem:[#allocation5 + $0x2b8] ss:$48 sps:$4 sm:$0xff]  }
 0x102   :  { %2027 = vmatprep.subr.bf16.mxu1 %v5941_v15  ;;  %v6080_v15 = vld [vmem:[#allocation5 + $0x860] ss:$48 sps:$4 sm:$0xff]  }
 0x104   :  { %2282 = vmatpush1.bf16.msra.mxu0 %v6014_v34  ;;  %v6115_v34 = vld [vmem:[#allocation8 + $0x4c] ss:$12 sps:$4 sm:$0xff]  }
 0x105   :  { %2028 = vmatpush1.bf16.msra.mxu1 %v5939_v19  ;;  %2283 = vmatprep.subr.bf16.mxu0 %v6022_v35  ;;  %v6037_v19 = vld [vmem:[#allocation5 + $0x1fc] ss:$48 sps:$4 sm:$0xff]   ;;  %v6053_v35 = vld [vmem:[#allocation5 + $0x318] ss:$48 sps:$4 sm:$0xff]  }
 0x106   :  { %2029 = vmatprep.subr.bf16.mxu1 %v5947_v20  ;;  %v6086_v20 = vld [vmem:[#allocation5 + $0x8c0] ss:$48 sps:$4 sm:$0xff]  }
 0x108   :  { %2284 = vmatpush1.bf16.msra.mxu0 %v6020_v38  ;;  %v6059_v38 = vld [vmem:[#allocation5 + $0x378] ss:$48 sps:$4 sm:$0xff]  }
 0x109   :  { %2030 = vmatpush1.bf16.msra.mxu1 %v5945_v23  ;;  %2285 = vmatprep.subr.bf16.mxu0 %v6028_v39  ;;  %v6043_v23 = vld [vmem:[#allocation5 + $0x25c] ss:$48 sps:$4 sm:$0xff]  }
 0x10a   :  { %2031 = vmatprep.subr.bf16.mxu1 %v5953_v24  ;;  %v6095_v24 = vld [vmem:[#allocation8] ss:$12 sps:$4 sm:$0xff]  }
 0x10b   :  { %v6067_v39 = vld [vmem:[#allocation5 + $0x3dc] ss:$48 sps:$4 sm:$0xff]  }
 0x10c   :  { %2286 = vmatpush1.bf16.msra.mxu0 %v6026_v42  ;;  %v6065_v42 = vld [vmem:[#allocation5 + $0x3d8] ss:$48 sps:$4 sm:$0xff]  }
 0x10d   :  { %2032 = vmatpush1.bf16.msra.mxu1 %v5951_v27  ;;  %2287 = vmatprep.subr.bf16.mxu0 %v6034_v43  ;;  %v6049_v27 = vld [vmem:[#allocation5 + $0x2bc] ss:$48 sps:$4 sm:$0xff]  }
 0x10e   :  { %2044 = vmatprep.subr.bf16.mxu1 %v5959_v29  ;;  %v6101_v29 = vld [vmem:[#allocation8 + $0x18] ss:$12 sps:$4 sm:$0xff]   ;;  %v6073_v43 = vld [vmem:[#allocation5 + $0x43c] ss:$48 sps:$4 sm:$0xff]  }
 0x110   :  { %2034 = vmatmul.mubr.bf16.vlgmr.msra.gmra.mrb[4].mxu1 %v6871_v57  ;;  %2288 = vmatpush1.bf16.msra.mxu0 %v6032_v46  ;;  %v6071_v46 = vld [vmem:[#allocation5 + $0x438] ss:$48 sps:$4 sm:$0xff]  }
 0x111   :  { %2045 = vmatpush1.bf16.msra.mxu1 %v5957_v32  ;;  %2076 = vmatprep.mubr.bf16.mxu1 %v6755_v63  ;;  %v6055_v32 = vld [vmem:[#allocation5 + $0x31c] ss:$48 sps:$4 sm:$0xff]  }
 0x112   :  { %2046 = vmatprep.subr.bf16.mxu1 %v5965_v33  ;;  %2289 = vmatprep.subr.bf16.mxu0 %v6040_v47  ;;  %v6107_v33 = vld [vmem:[#allocation8 + $0x30] ss:$12 sps:$4 sm:$0xff]  }
 0x113   :  { %v6079_v47 = vld [vmem:[#allocation5 + $0x49c] ss:$48 sps:$4 sm:$0xff]  }
 0x114   :  { %2290 = vmatpush1.bf16.msra.mxu0 %v6038_v50  ;;  %v6077_v50 = vld [vmem:[#allocation5 + $0x498] ss:$48 sps:$4 sm:$0xff]  }
 0x115   :  { %2047 = vmatpush1.bf16.msra.mxu1 %v5963_v36  ;;  %2302 = vmatprep.subr.bf16.mxu0 %v6046_v51  ;;  %v6061_v36 = vld [vmem:[#allocation5 + $0x37c] ss:$48 sps:$4 sm:$0xff]  }
 0x116   :  { %2048 = vmatprep.subr.bf16.mxu1 %v5971_v37  ;;  %v6113_v37 = vld [vmem:[#allocation8 + $0x48] ss:$12 sps:$4 sm:$0xff]   ;;  %v6085_v51 = vld [vmem:[#allocation5 + $0x4fc] ss:$48 sps:$4 sm:$0xff]  }
 0x117   :  { %2292 = vmatmul.mubr.bf16.vlgmr.msra.gmra.mrb[4].mxu0 %v6871_v57  ;;  %v6062_v57 = vld [vmem:[#allocation5 + $0x740] ss:$48 sps:$4 sm:$0xff]  }
 0x118   :  { %2303 = vmatpush1.bf16.msra.mxu0 %v6044_v54  ;;  %2334 = vmatprep.mubr.bf16.mxu0 %v6755_v63  ;;  %v6083_v54 = vld [vmem:[#allocation5 + $0x4f8] ss:$48 sps:$4 sm:$0xff]  }
 0x119   :  { %2049 = vmatpush1.bf16.msra.mxu1 %v5969_v40  ;;  %2304 = vmatprep.subr.bf16.mxu0 %v6052_v55  ;;  %v6119_v40 = vld [vmem:[#allocation8 + $0x60] ss:$12 sps:$4 sm:$0xff]  }
 0x11a   :  { %2050 = vmatprep.subr.bf16.mxu1 %v5977_v41  ;;  %v6127_v41 = vld [vmem:[#allocation8 + $0x7c] ss:$12 sps:$4 sm:$0xff]   ;;  %v6091_v55 = vld [vmem:[#allocation5 + $0x55c] ss:$48 sps:$4 sm:$0xff]  }
 0x11c   :  { %2305 = vmatpush1.bf16.msra.mxu0 %v6050_v59  ;;  %v6089_v59 = vld [vmem:[#allocation5 + $0x558] ss:$48 sps:$4 sm:$0xff]  }
 0x11d   :  { %2051 = vmatpush1.bf16.msra.mxu1 %v5975_v44  ;;  %2306 = vmatprep.subr.bf16.mxu0 %v6058_v60  ;;  %v6125_v44 = vld [vmem:[#allocation8 + $0x78] ss:$12 sps:$4 sm:$0xff]   ;;  %v6094_v60 = vld [vmem:[#allocation5 + $0x5bc] ss:$48 sps:$4 sm:$0xff]  }
 0x11e   :  { %2052 = vmatprep.subr.bf16.mxu1 %v5983_v45  ;;  %v6133_v45 = vld [vmem:[#allocation8 + $0x94] ss:$12 sps:$4 sm:$0xff]  }
 0x120   :  { %2307 = vmatpush1.bf16.msra.mxu0 %v6056_v0  ;;  %v6092_v0 = vld [vmem:[#allocation5 + $0x5b8] ss:$48 sps:$4 sm:$0xff]  }
 0x121   :  { %2053 = vmatpush1.bf16.msra.mxu1 %v5981_v48  ;;  %2308 = vmatprep.subr.bf16.mxu0 %v6064_v1  ;;  %v6131_v48 = vld [vmem:[#allocation8 + $0x90] ss:$12 sps:$4 sm:$0xff]  }
 0x122   :  { %2054 = vmatprep.subr.bf16.mxu1 %v5989_v49  ;;  %v6139_v49 = vld [vmem:[#allocation8 + $0xac] ss:$12 sps:$4 sm:$0xff]   ;;  %v6100_v1 = vld [vmem:[#allocation5 + $0x61c] ss:$48 sps:$4 sm:$0xff]  }
 0x124   :  { %2309 = vmatpush1.bf16.msra.mxu0 %v6062_v57  ;;  %v6163_v57 = vld [vmem:[#allocation8 + $0x10c] ss:$12 sps:$4 sm:$0xff]  }
 0x125   :  { %2055 = vmatpush1.bf16.msra.mxu1 %v5987_v52  ;;  %2310 = vmatprep.subr.bf16.mxu0 %v6070_v18  ;;  %v6137_v52 = vld [vmem:[#allocation8 + $0xa8] ss:$12 sps:$4 sm:$0xff]   ;;  %v6106_v18 = vld [vmem:[#allocation5 + $0x67c] ss:$48 sps:$4 sm:$0xff]  }
 0x126   :  { %2056 = vmatprep.subr.bf16.mxu1 %v5995_v53  ;;  %v6145_v53 = vld [vmem:[#allocation8 + $0xc4] ss:$12 sps:$4 sm:$0xff]  }
 0x128   :  { %2311 = vmatpush1.bf16.msra.mxu0 %v6068_v7  ;;  %v6892_v7 = vld [vmem:[#allocation2] ss:$12 sps:$4 sm:$0xff]  }
 0x129   :  { %2057 = vmatpush1.bf16.msra.mxu1 %v5993_v56  ;;  %2312 = vmatprep.subr.bf16.mxu0 %v6076_v9  ;;  %v6143_v56 = vld [vmem:[#allocation8 + $0xc0] ss:$12 sps:$4 sm:$0xff]  }
 0x12a   :  { %2058 = vmatprep.subr.bf16.mxu1 %v6001_v58  ;;  %v6151_v58 = vld [vmem:[#allocation8 + $0xdc] ss:$12 sps:$4 sm:$0xff]   ;;  %v6112_v9 = vld [vmem:[#allocation5 + $0x6dc] ss:$48 sps:$4 sm:$0xff]  }
 0x12c   :  { %2313 = vmatpush1.bf16.msra.mxu0 %v6074_v11  ;;  %v6175_v11 = vld [vmem:[#allocation8 + $0x13c] ss:$12 sps:$4 sm:$0xff]  }
 0x12d   :  { %2059 = vmatpush1.bf16.msra.mxu1 %v5999_v61  ;;  %2314 = vmatprep.subr.bf16.mxu0 %v6082_v12  ;;  %v6149_v61 = vld [vmem:[#allocation8 + $0xd8] ss:$12 sps:$4 sm:$0xff]   ;;  %v6110_v12 = vld [vmem:[#allocation5 + $0x6d8] ss:$48 sps:$4 sm:$0xff]  }
 0x12e   :  { %2173 = vmatprep.subr.bf16.mxu1 %v6007_v62  ;;  %v6157_v62 = vld [vmem:[#allocation8 + $0xf4] ss:$12 sps:$4 sm:$0xff]  }
 0x130   :  { %2077 = vmatmul.mubr.bf16.vlgmr.msra.gmra.mrb[4].mxu1 %v6877_v28  ;;  %2315 = vmatpush1.bf16.msra.mxu0 %v6080_v15  ;;  %v6181_v15 = vld [vmem:[#allocation8 + $0x154] ss:$12 sps:$4 sm:$0xff]  }
 0x131   :  { %2174 = vmatpush1.bf16.msra.mxu1 %v6005_v2  ;;  %2205 = vmatprep.mubr.bf16.mxu1 %v6888_v6  ;;  %v6155_v2 = vld [vmem:[#allocation8 + $0xf0] ss:$12 sps:$4 sm:$0xff]  }
 0x132   :  { %2175 = vmatprep.subr.bf16.mxu1 %v6013_v3  ;;  %2316 = vmatprep.subr.bf16.mxu0 %v6088_v16  ;;  %v6098_v3 = vld [vmem:[#allocation5 + $0x618] ss:$48 sps:$4 sm:$0xff]  }
 0x133   :  { %v6116_v16 = vld [vmem:[#allocation5 + $0x738] ss:$48 sps:$4 sm:$0xff]  }
 0x134   :  { %2317 = vmatpush1.bf16.msra.mxu0 %v6086_v20  ;;  %v6187_v20 = vld [vmem:[#allocation8 + $0x16c] ss:$12 sps:$4 sm:$0xff]  }
 0x135   :  { %2176 = vmatpush1.bf16.msra.mxu1 %v6011_v4  ;;  %4404 = vmatprep.subr.bf16.mxu0 %v6097_v21  ;;  %v6161_v4 = vld [vmem:[#allocation8 + $0x108] ss:$12 sps:$4 sm:$0xff]   ;;  %v6122_v21 = vld [vmem:[#allocation5 + $0x798] ss:$48 sps:$4 sm:$0xff]  }
 0x136   :  { %2177 = vmatprep.subr.bf16.mxu1 %v6019_v5  ;;  %v6169_v5 = vld [vmem:[#allocation8 + $0x124] ss:$12 sps:$4 sm:$0xff]  }
 0x137   :  { %2335 = vmatmul.mubr.bf16.vlgmr.msra.gmra.mrb[4].mxu0 %v6877_v28  ;;  %v6121_v28 = vld [vmem:[#allocation8 + $0x64] ss:$12 sps:$4 sm:$0xff]  }
 0x138   :  { %4405 = vmatpush1.bf16.msra.mxu0 %v6095_v24  ;;  %v6217_v24 = vld [vmem:[#allocation8 + $0x184] ss:$12 sps:$4 sm:$0xff]  }
 0x139   :  { %2178 = vmatpush1.bf16.msra.mxu1 %v6017_v8  ;;  %4406 = vmatprep.subr.bf16.mxu0 %v6103_v25  ;;  %v6104_v8 = vld [vmem:[#allocation5 + $0x678] ss:$48 sps:$4 sm:$0xff]  }
 0x13a   :  { %2179 = vmatprep.subr.bf16.mxu1 %v6025_v10  ;;  %v6167_v10 = vld [vmem:[#allocation8 + $0x120] ss:$12 sps:$4 sm:$0xff]  }
 0x13b   :  { %v6128_v25 = vld [vmem:[#allocation5 + $0x7f8] ss:$48 sps:$4 sm:$0xff]  }
 0x13c   :  { %4407 = vmatpush1.bf16.msra.mxu0 %v6101_v29  ;;  %v6142_v29 = vld [vmem:[#allocation5 + $0x8bc] ss:$48 sps:$4 sm:$0xff]  }
 0x13d   :  { %2180 = vmatpush1.bf16.msra.mxu1 %v6023_v13  ;;  %4408 = vmatprep.subr.bf16.mxu0 %v6109_v30  ;;  %v6118_v13 = vld [vmem:[#allocation5 + $0x73c] ss:$48 sps:$4 sm:$0xff]   ;;  %v6140_v30 = vld [vmem:[#allocation5 + $0x8b8] ss:$48 sps:$4 sm:$0xff]  }
 0x13e   :  { %2181 = vmatprep.subr.bf16.mxu1 %v6031_v14  ;;  %v6173_v14 = vld [vmem:[#allocation8 + $0x138] ss:$12 sps:$4 sm:$0xff]  }
 0x140   :  { %4409 = vmatpush1.bf16.msra.mxu0 %v6107_v33  ;;  %v6154_v33 = vld [vmem:[#allocation5 + $0x8c] ss:$48 sps:$4 sm:$0xff]  }
 0x141   :  { %2182 = vmatpush1.bf16.msra.mxu1 %v6029_v17  ;;  %4410 = vmatprep.subr.bf16.mxu0 %v6115_v34  ;;  %v6124_v17 = vld [vmem:[#allocation5 + $0x79c] ss:$48 sps:$4 sm:$0xff]  }
 0x142   :  { %2183 = vmatprep.subr.bf16.mxu1 %v6037_v19  ;;  %v6179_v19 = vld [vmem:[#allocation8 + $0x150] ss:$12 sps:$4 sm:$0xff]  }
 0x143   :  { %v6896_v34 = vld [vmem:[#allocation2 + $0x8] ss:$12 sps:$4 sm:$0xff]  }
 0x144   :  { %4411 = vmatpush1.bf16.msra.mxu0 %v6113_v37  ;;  %v6158_v37 = vld [vmem:[#allocation5 + $0xe8] ss:$48 sps:$4 sm:$0xff]  }
 0x145   :  { %2184 = vmatpush1.bf16.msra.mxu1 %v6035_v22  ;;  %4412 = vmatprep.subr.bf16.mxu0 %v6121_v28  ;;  %v6130_v22 = vld [vmem:[#allocation5 + $0x7fc] ss:$48 sps:$4 sm:$0xff]   ;;  %v399_v28 = vlaneseq }
 0x146   :  { %2185 = vmatprep.subr.bf16.mxu1 %v6043_v23  ;;  %v6185_v23 = vld [vmem:[#allocation8 + $0x168] ss:$12 sps:$4 sm:$0xff]  }
 0x148   :  { %4413 = vmatpush1.bf16.msra.mxu0 %v6119_v40  ;;  %v6900_v40 = vshrl.u32 %v399_v28, 7  ;;  %v6203_v28 = vld [vmem:[#allocation5 + $0x4a8] ss:$48 sps:$4 sm:$0xff]  }
 0x149   :  { %2186 = vmatpush1.bf16.msra.mxu1 %v6041_v26  ;;  %4414 = vmatprep.subr.bf16.mxu0 %v6127_v41  ;;  %v6136_v26 = vld [vmem:[#allocation5 + $0x85c] ss:$48 sps:$4 sm:$0xff]  }
 0x14a   :  { %2187 = vmatprep.subr.bf16.mxu1 %v6049_v27  ;;  %v6134_v27 = vld [vmem:[#allocation5 + $0x858] ss:$48 sps:$4 sm:$0xff]   ;;  %v6172_v41 = vld [vmem:[#allocation5 + $0x1ac] ss:$48 sps:$4 sm:$0xff]  }
 0x14c   :  { %4415 = vmatpush1.bf16.msra.mxu0 %v6125_v44  ;;  %v6905_v44 = vsub.s32 0, %v6900_v40 }
 0x14d   :  { %2188 = vmatpush1.bf16.msra.mxu1 %v6047_v31  ;;  %4416 = vmatprep.subr.bf16.mxu0 %v6133_v45  ;;  %v6148_v31 = vld [vmem:[#allocation5 + $0x2c] ss:$48 sps:$4 sm:$0xff]  }
 0x14e   :  { %2189 = vmatprep.subr.bf16.mxu1 %v6055_v32  ;;  %v6146_v32 = vld [vmem:[#allocation5 + $0x28] ss:$48 sps:$4 sm:$0xff]   ;;  %v6178_v45 = vld [vmem:[#allocation5 + $0x20c] ss:$48 sps:$4 sm:$0xff]  }
 0x150   :  { %4417 = vmatpush1.bf16.msra.mxu0 %v6131_v48  ;;  %v6184_v48 = vld [vmem:[#allocation5 + $0x26c] ss:$48 sps:$4 sm:$0xff]  }
 0x151   :  { %2190 = vmatpush1.bf16.msra.mxu1 %v6053_v35  ;;  %4418 = vmatprep.subr.bf16.mxu0 %v6139_v49  ;;  %v6152_v35 = vld [vmem:[#allocation5 + $0x88] ss:$48 sps:$4 sm:$0xff]  }
 0x152   :  { %2191 = vmatprep.subr.bf16.mxu1 %v6061_v36  ;;  %v6160_v36 = vld [vmem:[#allocation5 + $0xec] ss:$48 sps:$4 sm:$0xff]  }
 0x154   :  { %4419 = vmatpush1.bf16.msra.mxu0 %v6137_v52 }
 0x155   :  { %2192 = vmatpush1.bf16.msra.mxu1 %v6059_v38  ;;  %4420 = vmatprep.subr.bf16.mxu0 %v6145_v53  ;;  %v6166_v38 = vld [vmem:[#allocation5 + $0x14c] ss:$48 sps:$4 sm:$0xff]   ;;  %v6182_v53 = vld [vmem:[#allocation5 + $0x268] ss:$48 sps:$4 sm:$0xff]  }
 0x156   :  { %2193 = vmatprep.subr.bf16.mxu1 %v6067_v39  ;;  %v6164_v39 = vld [vmem:[#allocation5 + $0x148] ss:$48 sps:$4 sm:$0xff]  }
 0x158   :  { %4421 = vmatpush1.bf16.msra.mxu0 %v6143_v56 }
 0x159   :  { %2194 = vmatpush1.bf16.msra.mxu1 %v6065_v42  ;;  %4422 = vmatprep.subr.bf16.mxu0 %v6151_v58  ;;  %v6170_v42 = vld [vmem:[#allocation5 + $0x1a8] ss:$48 sps:$4 sm:$0xff]  }
 0x15a   :  { %2195 = vmatprep.subr.bf16.mxu1 %v6073_v43  ;;  %v6902_v43 = vld [vmem:[#allocation7] sm:$0xff] }
 0x15c   :  { %4423 = vmatpush1.bf16.msra.mxu0 %v6149_v61  ;;  %v6188_v61 = vld [vmem:[#allocation5 + $0x2c8] ss:$48 sps:$4 sm:$0xff]  }
 0x15d   :  { %2196 = vmatpush1.bf16.msra.mxu1 %v6071_v46  ;;  %4424 = vmatprep.subr.bf16.mxu0 %v6157_v62  ;;  %v6176_v46 = vld [vmem:[#allocation5 + $0x208] ss:$48 sps:$4 sm:$0xff]  }
 0x15e   :  { %2197 = vmatprep.subr.bf16.mxu1 %v6079_v47  ;;  %v402_v47 = vrot.slane %v6902_v43, %v6905_v44 }
 0x160   :  { %4425 = vmatpush1.bf16.msra.mxu0 %v6155_v2  ;;  %v6193_v2 = vld [vmem:[#allocation5 + $0x32c] ss:$48 sps:$4 sm:$0xff]  }
 0x161   :  { %2198 = vmatpush1.bf16.msra.mxu1 %v6077_v50  ;;  %4426 = vmatprep.subr.bf16.mxu0 %v6163_v57 }
 0x162   :  { %2199 = vmatprep.subr.bf16.mxu1 %v6085_v51 }
 0x164   :  { %4427 = vmatpush1.bf16.msra.mxu0 %v6161_v4  ;;  %v6191_v4 = vld [vmem:[#allocation5 + $0x328] ss:$48 sps:$4 sm:$0xff]  }
 0x165   :  { %2200 = vmatpush1.bf16.msra.mxu1 %v6083_v54  ;;  %4428 = vmatprep.subr.bf16.mxu0 %v6169_v5  ;;  %v6190_v54 = vld [vmem:[#allocation5 + $0x2cc] ss:$48 sps:$4 sm:$0xff]  }
 0x166   :  { %2201 = vmatprep.subr.bf16.mxu1 %v6091_v55  ;;  %v6215_v5 = vld [vmem:[#allocation8 + $0x180] ss:$12 sps:$4 sm:$0xff]  }
 0x168   :  { %4429 = vmatpush1.bf16.msra.mxu0 %v6167_v10  ;;  %v6194_v10 = vld [vmem:[#allocation5 + $0x388] ss:$48 sps:$4 sm:$0xff]  }
 0x169   :  { %2202 = vmatpush1.bf16.msra.mxu1 %v6089_v59  ;;  %4430 = vmatprep.subr.bf16.mxu0 %v6175_v11  ;;  %v6221_v11 = vld [vmem:[#allocation8 + $0x198] ss:$12 sps:$4 sm:$0xff]  }
 0x16a   :  { %2203 = vmatprep.subr.bf16.mxu1 %v6094_v60 }
 0x16c   :  { %4431 = vmatpush1.bf16.msra.mxu0 %v6173_v14  ;;  %v417_v14 = vsub.s32 4, %v6900_v40 }
 0x16d   :  { %2204 = vmatpush1.bf16.msra.mxu1 %v6092_v0  ;;  %4432 = vmatprep.subr.bf16.mxu0 %v6181_v15  ;;  %v421_v15 = vsub.s32 5, %v6900_v40 }
 0x16e   :  { %2216 = vmatprep.subr.bf16.mxu1 %v6100_v1 }
 0x170   :  { %2206 = vmatmul.mubr.bf16.vlgmr.msra.gmra.mrb[8].mxu1 %v6892_v7  ;;  %4433 = vmatpush1.bf16.msra.mxu0 %v6179_v19  ;;  %v6202_v19 = vld [vmem:[#allocation5 + $0x44c] ss:$48 sps:$4 sm:$0xff]  }
 0x171   :  { %2217 = vmatpush1.bf16.msra.mxu1 %v6098_v3  ;;  %2248 = vmatprep.mubr.bf16.mxu1 %v6755_v63 }
 0x172   :  { %2218 = vmatprep.subr.bf16.mxu1 %v6106_v18  ;;  %4434 = vmatprep.subr.bf16.mxu0 %v6187_v20  ;;  %v6235_v20 = vld [vmem:[#allocation8 + $0x1cc] ss:$12 sps:$4 sm:$0xff]  }
 0x174   :  { %4435 = vmatpush1.bf16.msra.mxu0 %v6185_v23  ;;  %v6200_v23 = vld [vmem:[#allocation5 + $0x448] ss:$48 sps:$4 sm:$0xff]  }
 0x175   :  { %2219 = vmatpush1.bf16.msra.mxu1 %v6104_v8  ;;  %4447 = vmatprep.subr.bf16.mxu0 %v6217_v24  ;;  %v6196_v8 = vld [vmem:[#allocation5 + $0x38c] ss:$48 sps:$4 sm:$0xff]   ;;  %v6233_v24 = vld [vmem:[#allocation8 + $0x1c8] ss:$12 sps:$4 sm:$0xff]  }
 0x176   :  { %2220 = vmatprep.subr.bf16.mxu1 %v6112_v9  ;;  %v6223_v9 = vld [vmem:[#allocation8 + $0x19c] ss:$12 sps:$4 sm:$0xff]  }
 0x179   :  { %2221 = vmatpush1.bf16.msra.mxu1 %v6110_v12  ;;  %v6199_v12 = vld [vmem:[#allocation5 + $0x3ec] ss:$48 sps:$4 sm:$0xff]  }
 0x17a   :  { %2222 = vmatprep.subr.bf16.mxu1 %v6118_v13  ;;  %v6229_v13 = vld [vmem:[#allocation8 + $0x1b4] ss:$12 sps:$4 sm:$0xff]  }
 0x17d   :  { %2223 = vmatpush1.bf16.msra.mxu1 %v6116_v16  ;;  %v6197_v16 = vld [vmem:[#allocation5 + $0x3e8] ss:$48 sps:$4 sm:$0xff]  }
 0x17e   :  { %2224 = vmatprep.subr.bf16.mxu1 %v6124_v17  ;;  %v6227_v17 = vld [vmem:[#allocation8 + $0x1b0] ss:$12 sps:$4 sm:$0xff]  }
 0x181   :  { %2225 = vmatpush1.bf16.msra.mxu1 %v6122_v21  ;;  %v418_v21 = vrot.slane %v6902_v43, %v417_v14  ;;  %v6277_v14 = vld [vmem:[#allocation8 + $0x288] ss:$12 sps:$4 sm:$0xff]  }
 0x182   :  { %2226 = vmatprep.subr.bf16.mxu1 %v6130_v22  ;;  %v422_v22 = vrot.slane %v6902_v43, %v421_v15  ;;  %v6284_v15 = vld [vmem:[#allocation8 + $0x2a4] ss:$12 sps:$4 sm:$0xff]  }
 0x185   :  { %2227 = vmatpush1.bf16.msra.mxu1 %v6128_v25  ;;  %v6205_v25 = vld [vmem:[#allocation5 + $0x4ac] ss:$48 sps:$4 sm:$0xff]  }
 0x186   :  { %2228 = vmatprep.subr.bf16.mxu1 %v6136_v26  ;;  %v6241_v26 = vld [vmem:[#allocation8 + $0x1e4] ss:$12 sps:$4 sm:$0xff]  }
 0x189   :  { %2229 = vmatpush1.bf16.msra.mxu1 %v6134_v27 }
 0x18a   :  { %2230 = vmatprep.subr.bf16.mxu1 %v6142_v29 }
 0x18d   :  { %2231 = vmatpush1.bf16.msra.mxu1 %v6140_v30 }
 0x18e   :  { %2345 = vmatprep.subr.bf16.mxu1 %v6148_v31 }
 0x190   :  { %2249 = vmatmul.mubr.bf16.vlgmr.msra.gmra.mrb[8].mxu1 %v6896_v34 }
 0x191   :  { %2346 = vmatpush1.bf16.msra.mxu1 %v6146_v32  ;;  %2377 = vmatprep.mubr.bf16.mxu1 %v6888_v6  ;;  %v6908_v6 = vsub.s32 1, %v6900_v40 }
 0x192   :  { %2347 = vmatprep.subr.bf16.mxu1 %v6154_v33  ;;  %v6239_v33 = vld [vmem:[#allocation8 + $0x1e0] ss:$12 sps:$4 sm:$0xff]  }
 0x193   :  { %v406_v49 = vrot.slane %v6902_v43, %v6908_v6 }
 0x195   :  { %2348 = vmatpush1.bf16.msra.mxu1 %v6152_v35 }
 0x196   :  { %2349 = vmatprep.subr.bf16.mxu1 %v6160_v36 }
 0x199   :  { %2350 = vmatpush1.bf16.msra.mxu1 %v6158_v37 }
 0x19a   :  { %2351 = vmatprep.subr.bf16.mxu1 %v6166_v38 }
 0x19d   :  { %2352 = vmatpush1.bf16.msra.mxu1 %v6164_v39 }
 0x19e   :  { %2353 = vmatprep.subr.bf16.mxu1 %v6172_v41  ;;  %v6247_v41 = vld [vmem:[#allocation8 + $0x1fc] ss:$12 sps:$4 sm:$0xff]  }
 0x1a1   :  { %2354 = vmatpush1.bf16.msra.mxu1 %v6170_v42  ;;  %v6208_v42 = vld [vmem:[#allocation5 + $0x50c] ss:$48 sps:$4 sm:$0xff]  }
 0x1a2   :  { %2355 = vmatprep.subr.bf16.mxu1 %v6178_v45 }
 0x1a3   :  { %v1992_v50 = vpop.f32.mrb[0].mxu1 }
 0x1a4   :  { %v5669_v51 = vadd.f32 %v1992_v50, %v402_v47  ;;  %v1994_v52 = vpop.f32.mrb[1].mxu1  ;;  %v6211_v50 = vld [vmem:[#allocation5 + $0x56c] ss:$48 sps:$4 sm:$0xff]  }
 0x1a5   :  { %v5670_v55 = vadd.f32 %v1994_v52, %v406_v49  ;;  %v1996_v56 = vpop.f32.mrb[2].mxu1  ;;  %2356 = vmatpush1.bf16.msra.mxu1 %v6176_v46  ;;  %v6253_v52 = vld [vmem:[#allocation8 + $0x214] ss:$12 sps:$4 sm:$0xff]  }
 0x1a6   :  { %v5671_v58 = vadd.f32 %v1996_v56, %v402_v47  ;;  %v1998_v59 = vpop.f32.mrb[3].mxu1  ;;  %2357 = vmatprep.subr.bf16.mxu1 %v6184_v48  ;;  %v2431_v62 = vmax.f32 %v5669_v51, 0.0  ;;  %v6206_v47 = vld [vmem:[#allocation5 + $0x508] ss:$48 sps:$4 sm:$0xff]  }
 0x1a7   :  { %v5672_v60 = vadd.f32 %v1998_v59, %v406_v49  ;;  %v2432_v0 = vmax.f32 %v5670_v55, 0.0  ;;  %v6245_v49 = vld [vmem:[#allocation8 + $0x1f8] ss:$12 sps:$4 sm:$0xff]   ;;  %v6214_v55 = vld [vmem:[#allocation5 + $0x5cc] ss:$48 sps:$4 sm:$0xff]  }
 0x1a8   :  { %v2443_v1 = vmax.f32 %v5671_v58, 0.0  ;;  %v6259_v56 = vld [vmem:[#allocation8 + $0x22c] ss:$12 sps:$4 sm:$0xff]   ;;  %v6257_v59 = vld [vmem:[#allocation8 + $0x228] ss:$12 sps:$4 sm:$0xff]  }
 0x1a9   :  { %v2444_v3 = vmax.f32 %v5672_v60, 0.0  ;;  %2358 = vmatpush1.bf16.msra.mxu1 %v6182_v53  ;;  %v6209_v53 = vld [vmem:[#allocation5 + $0x568] ss:$48 sps:$4 sm:$0xff]   ;;  %v6220_v60 = vld [vmem:[#allocation5 + $0x62c] ss:$48 sps:$4 sm:$0xff]  }
 0x1aa   :  { %v6914_v57 = vpack.c.bf16 %v2443_v1, %v2431_v62  ;;  %2359 = vmatprep.subr.bf16.mxu1 %v6190_v54  ;;  %v2164_v27 = vpop.f32.mrb[0].mxu0  ;;  %v6251_v54 = vld [vmem:[#allocation8 + $0x210] ss:$12 sps:$4 sm:$0xff]   ;;  %v6263_v62 = vld [vmem:[#allocation8 + $0x240] ss:$12 sps:$4 sm:$0xff]  }
 0x1ab   :  { %v6916_v18 = vpack.c.bf16 %v2444_v3, %v2432_v0  ;;  %v5677_v29 = vadd.f32 %v2164_v27, %v418_v21  ;;  %v2166_v30 = vpop.f32.mrb[1].mxu0  ;;  %v6212_v58 = vld [vmem:[#allocation5 + $0x5c8] ss:$48 sps:$4 sm:$0xff]   ;;  %v6267_v3 = vld [vmem:[#allocation8 + $0x258] ss:$12 sps:$4 sm:$0xff]  }
 0x1ac   :  { %v5678_v31 = vadd.f32 %v2166_v30, %v422_v22  ;;  %v2168_v32 = vpop.f32.mrb[2].mxu0  ;;  %v6218_v0 = vld [vmem:[#allocation5 + $0x628] ss:$48 sps:$4 sm:$0xff]   ;;  %v6262_v27 = vld [vmem:[#allocation5 + $0x8cc] ss:$48 sps:$4 sm:$0xff]  }
 0x1ad   :  { %2360 = vmatpush1.bf16.msra.mxu1 %v6188_v61  ;;  %4436 = vmatprep.mubr.bf16.mxu0 %v6916_v18  ;;  %v2435_v35 = vmax.f32 %v5677_v29, 0.0  ;;  %v5679_v36 = vadd.f32 %v2168_v32, %v418_v21  ;;  %v2170_v37 = vpop.f32.mrb[3].mxu0  ;;  %v6265_v61 = vld [vmem:[#allocation8 + $0x244] ss:$12 sps:$4 sm:$0xff]   ;;  %v6269_v1 = vld [vmem:[#allocation8 + $0x25c] ss:$12 sps:$4 sm:$0xff]  }
 0x1ae   :  { %4437 = vmatmul.mubr.bf16.vlgmr.msra.gmra.mrb[8].mxu0 %v6914_v57  ;;  %2361 = vmatprep.subr.bf16.mxu1 %v6193_v2  ;;  %v2436_v38 = vmax.f32 %v5678_v31, 0.0  ;;  %v5680_v39 = vadd.f32 %v2170_v37, %v422_v22  ;;  %v6226_v2 = vld [vmem:[#allocation5 + $0x68c] ss:$48 sps:$4 sm:$0xff]   ;;  %v6287_v21 = vld [vmem:[#allocation8 + $0x2b8] ss:$12 sps:$4 sm:$0xff]  }
 0x1af   :  { %4448 = vmatpush1.bf16.msra.mxu0 %v6215_v5  ;;  %v2447_v45 = vmax.f32 %v5679_v36, 0.0  ;;  %v6232_v5 = vld [vmem:[#allocation5 + $0x6ec] ss:$48 sps:$4 sm:$0xff]   ;;  %v6297_v29 = vld [vmem:[#allocation8 + $0x2e8] ss:$12 sps:$4 sm:$0xff]  }
 0x1b0   :  { %4449 = vmatprep.subr.bf16.mxu0 %v6223_v9  ;;  %v2448_v46 = vmax.f32 %v5680_v39, 0.0  ;;  %v6230_v9 = vld [vmem:[#allocation5 + $0x6e8] ss:$48 sps:$4 sm:$0xff]   ;;  %v6256_v22 = vld [vmem:[#allocation5 + $0x86c] ss:$48 sps:$4 sm:$0xff]  }
 0x1b1   :  { %2362 = vmatpush1.bf16.msra.mxu1 %v6191_v4  ;;  %v6924_v48 = vpack.c.bf16 %v2447_v45, %v2435_v35  ;;  %v6224_v4 = vld [vmem:[#allocation5 + $0x688] ss:$48 sps:$4 sm:$0xff]   ;;  %v6304_v31 = vld [vmem:[#allocation8 + $0x304] ss:$12 sps:$4 sm:$0xff]   ;;  %v6266_v32 = vld [vmem:[#allocation8 + $0xc8] ss:$12 sps:$4 sm:$0xff]  }
 0x1b2   :  { %2363 = vmatprep.subr.bf16.mxu1 %v6196_v8  ;;  %v6926_v51 = vpack.c.bf16 %v2448_v46, %v2436_v38  ;;  %v6274_v8 = vld [vmem:[#allocation8 + $0x274] ss:$12 sps:$4 sm:$0xff]   ;;  %v6260_v30 = vld [vmem:[#allocation5 + $0x8c8] ss:$48 sps:$4 sm:$0xff]   ;;  %v6276_v37 = vld [vmem:[#allocation8 + $0xf8] ss:$12 sps:$4 sm:$0xff]  }
 0x1b3   :  { %4450 = vmatpush1.bf16.msra.mxu0 %v6221_v11  ;;  %v6238_v11 = vld [vmem:[#allocation5 + $0x74c] ss:$48 sps:$4 sm:$0xff]   ;;  %v6290_v45 = vld [vmem:[#allocation8 + $0x68] ss:$12 sps:$4 sm:$0xff]  }
 0x1b4   :  { %4451 = vmatprep.subr.bf16.mxu0 %v6229_v13  ;;  %v6236_v13 = vld [vmem:[#allocation5 + $0x748] ss:$48 sps:$4 sm:$0xff]  }
 0x1b5   :  { %2364 = vmatpush1.bf16.msra.mxu1 %v6194_v10  ;;  %v6272_v10 = vld [vmem:[#allocation8 + $0x270] ss:$12 sps:$4 sm:$0xff]   ;;  %v6271_v35 = vld [vmem:[#allocation8 + $0xe0] ss:$12 sps:$4 sm:$0xff]  }
 0x1b6   :  { %2365 = vmatprep.subr.bf16.mxu1 %v6199_v12  ;;  %v6279_v12 = vld [vmem:[#allocation8 + $0x28c] ss:$12 sps:$4 sm:$0xff]   ;;  %v6281_v38 = vld [vmem:[#allocation8 + $0x110] ss:$12 sps:$4 sm:$0xff]  }
 0x1b7   :  { %4452 = vmatpush1.bf16.msra.mxu0 %v6227_v17  ;;  %v6250_v17 = vld [vmem:[#allocation5 + $0x80c] ss:$48 sps:$4 sm:$0xff]  }
 0x1b8   :  { %4453 = vmatprep.subr.bf16.mxu0 %v6235_v20  ;;  %v6248_v20 = vld [vmem:[#allocation5 + $0x808] ss:$48 sps:$4 sm:$0xff]  }
 0x1b9   :  { %2366 = vmatpush1.bf16.msra.mxu1 %v6197_v16  ;;  %v6242_v16 = vld [vmem:[#allocation5 + $0x7a8] ss:$48 sps:$4 sm:$0xff]  }
 0x1ba   :  { %2367 = vmatprep.subr.bf16.mxu1 %v6202_v19  ;;  %v6289_v19 = vld [vmem:[#allocation8 + $0x2bc] ss:$12 sps:$4 sm:$0xff]   ;;  %v6275_v36 = vld [vmem:[#allocation8 + $0x20] ss:$12 sps:$4 sm:$0xff]  }
 0x1bb   :  { %4454 = vmatpush1.bf16.msra.mxu0 %v6233_v24  ;;  %v6292_v24 = vld [vmem:[#allocation8 + $0x2d0] ss:$12 sps:$4 sm:$0xff]  }
 0x1bc   :  { %4455 = vmatprep.subr.bf16.mxu0 %v6241_v26  ;;  %v6299_v26 = vld [vmem:[#allocation8 + $0x2ec] ss:$12 sps:$4 sm:$0xff]   ;;  %v6285_v39 = vld [vmem:[#allocation8 + $0x50] ss:$12 sps:$4 sm:$0xff]  }
 0x1bd   :  { %2368 = vmatpush1.bf16.msra.mxu1 %v6200_v23  ;;  %v6294_v23 = vld [vmem:[#allocation8 + $0x2d4] ss:$12 sps:$4 sm:$0xff]  }
 0x1be   :  { %2369 = vmatprep.subr.bf16.mxu1 %v6205_v25  ;;  %v6254_v25 = vld [vmem:[#allocation5 + $0x868] ss:$48 sps:$4 sm:$0xff]  }
 0x1bf   :  { %4456 = vmatpush1.bf16.msra.mxu0 %v6239_v33  ;;  %v6270_v33 = vld [vmem:[#allocation8 + $0x8] ss:$12 sps:$4 sm:$0xff]  }
 0x1c0   :  { %4457 = vmatprep.subr.bf16.mxu0 %v6247_v41  ;;  %v6286_v41 = vld [vmem:[#allocation8 + $0x128] ss:$12 sps:$4 sm:$0xff]  }
 0x1c1   :  { %2370 = vmatpush1.bf16.msra.mxu1 %v6203_v28  ;;  %v6280_v28 = vld [vmem:[#allocation8 + $0x38] ss:$12 sps:$4 sm:$0xff]  }
 0x1c2   :  { %2371 = vmatprep.subr.bf16.mxu1 %v6208_v42  ;;  %v6933_v42 = vsub.s32 2, %v6900_v40 }
 0x1c3   :  { %4458 = vmatpush1.bf16.msra.mxu0 %v6245_v49  ;;  %v6295_v49 = vld [vmem:[#allocation8 + $0x80] ss:$12 sps:$4 sm:$0xff]  }
 0x1c4   :  { %4459 = vmatprep.subr.bf16.mxu0 %v6253_v52  ;;  %v410_v46 = vrot.slane %v6902_v43, %v6933_v42 }
 0x1c5   :  { %2372 = vmatpush1.bf16.msra.mxu1 %v6206_v47 }
 0x1c6   :  { %2373 = vmatprep.subr.bf16.mxu1 %v6211_v50  ;;  %v6296_v50 = vld [vmem:[#allocation8 + $0x158] ss:$12 sps:$4 sm:$0xff]  }
 0x1c7   :  { %4460 = vmatpush1.bf16.msra.mxu0 %v6251_v54 }
 0x1c8   :  { %4461 = vmatprep.subr.bf16.mxu0 %v6259_v56 }
 0x1c9   :  { %2374 = vmatpush1.bf16.msra.mxu1 %v6209_v53 }
 0x1ca   :  { %2375 = vmatprep.subr.bf16.mxu1 %v6214_v55 }
 0x1cb   :  { %4462 = vmatpush1.bf16.msra.mxu0 %v6257_v59 }
 0x1cc   :  { %4463 = vmatprep.subr.bf16.mxu0 %v6265_v61  ;;  %v6301_v61 = vld [vmem:[#allocation8 + $0x170] ss:$12 sps:$4 sm:$0xff]  }
 0x1cd   :  { %2376 = vmatpush1.bf16.msra.mxu1 %v6212_v58  ;;  %v6300_v58 = vld [vmem:[#allocation8 + $0x98] ss:$12 sps:$4 sm:$0xff]  }
 0x1ce   :  { %2388 = vmatprep.subr.bf16.mxu1 %v6220_v60 }
 0x1cf   :  { %4464 = vmatpush1.bf16.msra.mxu0 %v6263_v62 }
 0x1d0   :  { %2378 = vmatmul.mubr.bf16.vlgmr.msra.gmra.mrb[12].mxu1 %v6892_v7  ;;  %4465 = vmatprep.subr.bf16.mxu0 %v6269_v1  ;;  %v6244_v7 = vld [vmem:[#allocation5 + $0x7ac] ss:$48 sps:$4 sm:$0xff]  }
 0x1d1   :  { %2389 = vmatpush1.bf16.msra.mxu1 %v6218_v0  ;;  %2420 = vmatprep.mubr.bf16.mxu1 %v6755_v63  ;;  %v6282_v63 = vld [vmem:[#allocation8 + $0x2a0] ss:$12 sps:$4 sm:$0xff]  }
 0x1d2   :  { %2390 = vmatprep.subr.bf16.mxu1 %v6226_v2 }
 0x1d3   :  { %4466 = vmatpush1.bf16.msra.mxu0 %v6267_v3 }
 0x1d4   :  { %4467 = vmatprep.subr.bf16.mxu0 %v6274_v8 }
 0x1d5   :  { %2391 = vmatpush1.bf16.msra.mxu1 %v6224_v4 }
 0x1d6   :  { %2392 = vmatprep.subr.bf16.mxu1 %v6232_v5  ;;  %v6306_v5 = vld [vmem:[#allocation8 + $0x248] ss:$12 sps:$4 sm:$0xff]  }
 0x1d7   :  { %4468 = vmatpush1.bf16.msra.mxu0 %v6272_v10  ;;  %v6309_v10 = vld [vmem:[#allocation8 + $0x31c] ss:$12 sps:$4 sm:$0xff]  }
 0x1d8   :  { %4469 = vmatprep.subr.bf16.mxu0 %v6279_v12  ;;  %v6311_v12 = vld [vmem:[#allocation8 + $0x260] ss:$12 sps:$4 sm:$0xff]  }
 0x1d9   :  { %2393 = vmatpush1.bf16.msra.mxu1 %v6230_v9  ;;  %v6302_v9 = vld [vmem:[#allocation8 + $0x300] ss:$12 sps:$4 sm:$0xff]  }
 0x1da   :  { %2394 = vmatprep.subr.bf16.mxu1 %v6238_v11  ;;  %v6310_v11 = vld [vmem:[#allocation8 + $0x188] ss:$12 sps:$4 sm:$0xff]  }
 0x1db   :  { %4470 = vmatpush1.bf16.msra.mxu0 %v6277_v14  ;;  %v6314_v14 = vld [vmem:[#allocation8 + $0x334] ss:$12 sps:$4 sm:$0xff]  }
 0x1dc   :  { %4471 = vmatprep.subr.bf16.mxu0 %v6284_v15  ;;  %v6316_v15 = vld [vmem:[#allocation8 + $0x278] ss:$12 sps:$4 sm:$0xff]  }
 0x1dd   :  { %2395 = vmatpush1.bf16.msra.mxu1 %v6236_v13  ;;  %v6307_v13 = vld [vmem:[#allocation8 + $0x318] ss:$12 sps:$4 sm:$0xff]  }
 0x1de   :  { %2396 = vmatprep.subr.bf16.mxu1 %v6244_v7  ;;  %v6315_v7 = vld [vmem:[#allocation8 + $0x1a0] ss:$12 sps:$4 sm:$0xff]  }
 0x1df   :  { %4472 = vmatpush1.bf16.msra.mxu0 %v6282_v63  ;;  %v6312_v63 = vld [vmem:[#allocation8 + $0x330] ss:$12 sps:$4 sm:$0xff]  }
 0x1e0   :  { %4473 = vmatprep.subr.bf16.mxu0 %v6289_v19  ;;  %v6320_v19 = vld [vmem:[#allocation8 + $0x1b8] ss:$12 sps:$4 sm:$0xff]  }
 0x1e1   :  { %2397 = vmatpush1.bf16.msra.mxu1 %v6242_v16  ;;  %v6946_v16 = vld [vmem:[#allocation7 + $0x8] sm:$0xf] }
 0x1e2   :  { %2398 = vmatprep.subr.bf16.mxu1 %v6250_v17  ;;  %v6319_v17 = vld [vmem:[#allocation8 + $0x34c] ss:$12 sps:$4 sm:$0xff]  }
 0x1e3   :  { %4474 = vmatpush1.bf16.msra.mxu0 %v6287_v21  ;;  %v438_v21 = vrot.slane %v6946_v16, %v6908_v6 }
 0x1e4   :  { %4475 = vmatprep.subr.bf16.mxu0 %v6294_v23  ;;  %v6324_v23 = vld [vmem:[#allocation8 + $0x364] ss:$12 sps:$4 sm:$0xff]  }
 0x1e5   :  { %2399 = vmatpush1.bf16.msra.mxu1 %v6248_v20  ;;  %v434_v20 = vrot.slane %v6946_v16, %v6905_v44 }
 0x1e6   :  { %2400 = vmatprep.subr.bf16.mxu1 %v6256_v22  ;;  %v6317_v22 = vld [vmem:[#allocation8 + $0x348] ss:$12 sps:$4 sm:$0xff]  }
 0x1e7   :  { %4476 = vmatpush1.bf16.msra.mxu0 %v6292_v24 }
 0x1e8   :  { %4477 = vmatprep.subr.bf16.mxu0 %v6299_v26 }
 0x1e9   :  { %2401 = vmatpush1.bf16.msra.mxu1 %v6254_v25  ;;  %v6325_v25 = vld [vmem:[#allocation8 + $0x1d0] ss:$12 sps:$4 sm:$0xff]  }
 0x1ea   :  { %2402 = vmatprep.subr.bf16.mxu1 %v6262_v27 }
 0x1eb   :  { %4478 = vmatpush1.bf16.msra.mxu0 %v6297_v29  ;;  %v6326_v29 = vld [vmem:[#allocation8 + $0x2a8] ss:$12 sps:$4 sm:$0xff]  }
 0x1ec   :  { %4490 = vmatprep.subr.bf16.mxu0 %v6304_v31 }
 0x1ed   :  { %2403 = vmatpush1.bf16.msra.mxu1 %v6260_v30 }
 0x1ee   :  { %5537 = vmatprep.subr.bf16.mxu1 %v6266_v32  ;;  %v6322_v32 = vld [vmem:[#allocation8 + $0x360] ss:$12 sps:$4 sm:$0xff]  }
 0x1f0   :  { %2421 = vmatmul.mubr.bf16.vlgmr.msra.gmra.mrb[12].mxu1 %v6896_v34  ;;  %v413_v34 = vsub.s32 3, %v6900_v40 }
 0x1f1   :  { %5538 = vmatpush3.bf16.msra.mxu1 %v6270_v33  ;;  %4694 = vmatprep.mubr.bf16.mxu1 %v6916_v18  ;;  %v6291_v18 = vld [vmem:[#allocation8 + $0x140] ss:$12 sps:$4 sm:$0xff]  }
 0x1f2   :  { %5539 = vmatprep.subr.bf16.mxu1 %v6271_v35  ;;  %v414_v47 = vrot.slane %v6902_v43, %v413_v34  ;;  %v6305_v43 = vld [vmem:[#allocation8 + $0xb0] ss:$12 sps:$4 sm:$0xff]  }
 0x1f5   :  { %5540 = vmatpush3.bf16.msra.mxu1 %v6275_v36 }
 0x1f6   :  { %5541 = vmatprep.subr.bf16.mxu1 %v6276_v37  ;;  %v6329_v37 = vld [vmem:[#allocation8 + $0x37c] ss:$12 sps:$4 sm:$0xff]  }
 0x1f9   :  { %5542 = vmatpush3.bf16.msra.mxu1 %v6280_v28 }
 0x1fa   :  { %5543 = vmatprep.subr.bf16.mxu1 %v6281_v38 }
 0x1fd   :  { %5544 = vmatpush3.bf16.msra.mxu1 %v6285_v39  ;;  %v6330_v39 = vld [vmem:[#allocation8 + $0x1e8] ss:$12 sps:$4 sm:$0xff]  }
 0x1fe   :  { %5545 = vmatprep.subr.bf16.mxu1 %v6286_v41 }
 0x201   :  { %5546 = vmatpush3.bf16.msra.mxu1 %v6290_v45  ;;  %v6331_v45 = vld [vmem:[#allocation8 + $0x2c0] ss:$12 sps:$4 sm:$0xff]  }
 0x202   :  { %5547 = vmatprep.subr.bf16.mxu1 %v6291_v18 }
 0x203   :  { %v2078_v52 = vpop.f32.mrb[4].mxu1 }
 0x204   :  { %v5673_v53 = vadd.f32 %v2078_v52, %v410_v46  ;;  %v2080_v54 = vpop.f32.mrb[5].mxu1  ;;  %v6335_v52 = vld [vmem:[#allocation8 + $0x200] ss:$12 sps:$4 sm:$0xff]  }
 0x205   :  { %v5674_v55 = vadd.f32 %v2080_v54, %v414_v47  ;;  %v2082_v56 = vpop.f32.mrb[6].mxu1  ;;  %5548 = vmatpush3.bf16.msra.mxu1 %v6295_v49  ;;  %v6334_v49 = vld [vmem:[#allocation8 + $0x394] ss:$12 sps:$4 sm:$0xff]   ;;  %v6332_v54 = vld [vmem:[#allocation8 + $0x390] ss:$12 sps:$4 sm:$0xff]  }
 0x206   :  { %v5675_v59 = vadd.f32 %v2082_v56, %v410_v46  ;;  %v2084_v60 = vpop.f32.mrb[7].mxu1  ;;  %5549 = vmatprep.subr.bf16.mxu1 %v6296_v50  ;;  %v2433_v0 = vmax.f32 %v5673_v53, 0.0  ;;  %v6327_v46 = vld [vmem:[#allocation8 + $0x378] ss:$12 sps:$4 sm:$0xff]  }
 0x207   :  { %v5676_v62 = vadd.f32 %v2084_v60, %v414_v47  ;;  %v2434_v2 = vmax.f32 %v5674_v55, 0.0  ;;  %v6336_v53 = vld [vmem:[#allocation8 + $0x2d8] ss:$12 sps:$4 sm:$0xff]  }
 0x208   :  { %v2445_v1 = vmax.f32 %v5675_v59, 0.0  ;;  %v6339_v55 = vld [vmem:[#allocation8 + $0x3ac] ss:$12 sps:$4 sm:$0xff]   ;;  %v6337_v59 = vld [vmem:[#allocation8 + $0x3a8] ss:$12 sps:$4 sm:$0xff]  }
 0x209   :  { %v2446_v3 = vmax.f32 %v5676_v62, 0.0  ;;  %5550 = vmatpush3.bf16.msra.mxu1 %v6300_v58  ;;  %v6340_v56 = vld [vmem:[#allocation8 + $0x218] ss:$12 sps:$4 sm:$0xff]   ;;  %v6341_v58 = vld [vmem:[#allocation8 + $0x2f0] ss:$12 sps:$4 sm:$0xff]  }
 0x20a   :  { %v6941_v4 = vpack.c.bf16 %v2445_v1, %v2433_v0  ;;  %5551 = vmatprep.subr.bf16.mxu1 %v6301_v61  ;;  %v2336_v24 = vpop.f32.mrb[4].mxu0  ;;  %v6344_v60 = vld [vmem:[#allocation8 + $0x3c4] ss:$12 sps:$4 sm:$0xff]   ;;  %v6346_v62 = vld [vmem:[#allocation8 + $0x3c8] ss:$12 sps:$4 sm:$0xff]  }
 0x20b   :  { %v2458_v8 = vpack.c.bf16 %v2446_v3, %v2434_v2  ;;  %v5685_v26 = vadd.f32 %v2336_v24, %v434_v20  ;;  %v2338_v27 = vpop.f32.mrb[5].mxu0  ;;  %v6345_v61 = vld [vmem:[#allocation8 + $0x230] ss:$12 sps:$4 sm:$0xff]   ;;  %v6342_v0 = vld [vmem:[#allocation8 + $0x3c0] ss:$12 sps:$4 sm:$0xff]  }
 0x20c   :  { %v5686_v30 = vadd.f32 %v2338_v27, %v438_v21  ;;  %v2340_v31 = vpop.f32.mrb[6].mxu0  ;;  %v6349_v1 = vld [vmem:[#allocation8 + $0x3dc] ss:$12 sps:$4 sm:$0xff]   ;;  %v6351_v3 = vld [vmem:[#allocation8 + $0x3e0] ss:$12 sps:$4 sm:$0xff]  }
 0x20d   :  { %4479 = vmatprep.mubr.bf16.mxu0 %v2458_v8  ;;  %5552 = vmatpush3.bf16.msra.mxu1 %v6305_v43  ;;  %v2439_v33 = vmax.f32 %v5685_v26, 0.0  ;;  %v5687_v35 = vadd.f32 %v2340_v31, %v434_v20  ;;  %v2342_v36 = vpop.f32.mrb[7].mxu0  ;;  %v6350_v2 = vld [vmem:[#allocation8 + $0x308] ss:$12 sps:$4 sm:$0xff]   ;;  %v6347_v43 = vld [vmem:[#allocation8 + $0x3d8] ss:$12 sps:$4 sm:$0xff]  }
 0x20e   :  { %4480 = vmatmul.mubr.bf16.vlgmr.msra.gmra.mrb[8].mxu0 %v6941_v4  ;;  %5559 = vmatprep.subr.bf16.mxu1 %v6306_v5  ;;  %v2440_v28 = vmax.f32 %v5686_v30, 0.0  ;;  %v5688_v38 = vadd.f32 %v2342_v36, %v438_v21  ;;  %v6354_v5 = vld [vmem:[#allocation8 + $0x3f4] ss:$12 sps:$4 sm:$0xff]   ;;  %v6367_v20 = vld [vmem:[#allocation8 + $0x438] ss:$12 sps:$4 sm:$0xff]  }
 0x20f   :  { %4491 = vmatpush1.bf16.msra.mxu0 %v6302_v9  ;;  %4522 = vmatprep.mubr.bf16.mxu0 %v6926_v51  ;;  %v2451_v41 = vmax.f32 %v5687_v35, 0.0  ;;  %v6356_v9 = vld [vmem:[#allocation8 + $0x3f8] ss:$12 sps:$4 sm:$0xff]   ;;  %v6375_v21 = vld [vmem:[#allocation8 + $0x380] ss:$12 sps:$4 sm:$0xff]  }
 0x210   :  { %4695 = vmatmul.mubr.bf16.vlgmr.msra.gmra.mrb[16].mxu1 %v6914_v57  ;;  %4492 = vmatprep.subr.bf16.mxu0 %v6309_v10  ;;  %v6321_v57 = vld [vmem:[#allocation8 + $0x290] ss:$12 sps:$4 sm:$0xff]   ;;  %v2452_v18 = vmax.f32 %v5688_v38, 0.0  ;;  %v6379_v24 = vld [vmem:[#allocation8 + $0x46c] ss:$12 sps:$4 sm:$0xff]  }
 0x211   :  { %5560 = vmatpush3.bf16.msra.mxu1 %v6310_v11  ;;  %4735 = vmatprep.mubr.bf16.mxu1 %v2458_v8  ;;  %v6952_v47 = vpack.c.bf16 %v2451_v41, %v2439_v33  ;;  %v6355_v8 = vld [vmem:[#allocation8 + $0x320] ss:$12 sps:$4 sm:$0xff]   ;;  %v6352_v10 = vld [vmem:[#allocation8 + $0x3f0] ss:$12 sps:$4 sm:$0xff]   ;;  %v6377_v27 = vld [vmem:[#allocation8 + $0x468] ss:$12 sps:$4 sm:$0xff]  }
 0x212   :  { %5561 = vmatprep.subr.bf16.mxu1 %v6311_v12  ;;  %v6954_v50 = vpack.c.bf16 %v2452_v18, %v2440_v28  ;;  %v6359_v11 = vld [vmem:[#allocation8 + $0x40c] ss:$12 sps:$4 sm:$0xff]   ;;  %v6381_v26 = vld [vmem:[#allocation8 + $0x470] ss:$12 sps:$4 sm:$0xff]   ;;  %v6386_v31 = vld [vmem:[#allocation8 + $0x548] ss:$12 sps:$4 sm:$0xff]  }
 0x213   :  { %4493 = vmatpush1.bf16.msra.mxu0 %v6307_v13  ;;  %v6360_v12 = vld [vmem:[#allocation8 + $0x338] ss:$12 sps:$4 sm:$0xff]   ;;  %v6361_v13 = vld [vmem:[#allocation8 + $0x410] ss:$12 sps:$4 sm:$0xff]   ;;  %v6390_v35 = vld [vmem:[#allocation8 + $0x488] ss:$12 sps:$4 sm:$0xff]  }
 0x214   :  { %4494 = vmatprep.subr.bf16.mxu0 %v6314_v14  ;;  %v6357_v14 = vld [vmem:[#allocation8 + $0x408] ss:$12 sps:$4 sm:$0xff]   ;;  %v6385_v30 = vld [vmem:[#allocation8 + $0x3b0] ss:$12 sps:$4 sm:$0xff]   ;;  %v6391_v36 = vld [vmem:[#allocation8 + $0x560] ss:$12 sps:$4 sm:$0xff]  }
 0x215   :  { %5562 = vmatpush3.bf16.msra.mxu1 %v6315_v7  ;;  %v6365_v7 = vld [vmem:[#allocation8 + $0x350] ss:$12 sps:$4 sm:$0xff]   ;;  %v6394_v28 = vld [vmem:[#allocation8 + $0x4b4] ss:$12 sps:$4 sm:$0xff]   ;;  %v6400_v18 = vld [vmem:[#allocation8 + $0x4b8] ss:$12 sps:$4 sm:$0xff]  }
 0x216   :  { %5563 = vmatprep.subr.bf16.mxu1 %v6316_v15  ;;  %v6366_v15 = vld [vmem:[#allocation8 + $0x428] ss:$12 sps:$4 sm:$0xff]   ;;  %v6395_v38 = vld [vmem:[#allocation8 + $0x4a0] ss:$12 sps:$4 sm:$0xff]   ;;  %v6392_v41 = vld [vmem:[#allocation8 + $0x4b0] ss:$12 sps:$4 sm:$0xff]  }
 0x217   :  { %4495 = vmatpush1.bf16.msra.mxu0 %v6312_v63  ;;  %v6369_v63 = vld [vmem:[#allocation8 + $0x43c] ss:$12 sps:$4 sm:$0xff]  }
 0x218   :  { %4496 = vmatprep.subr.bf16.mxu0 %v6319_v17  ;;  %v6370_v17 = vld [vmem:[#allocation8 + $0x368] ss:$12 sps:$4 sm:$0xff]  }
 0x219   :  { %5564 = vmatpush3.bf16.msra.mxu1 %v6320_v19  ;;  %v6371_v19 = vld [vmem:[#allocation8 + $0x440] ss:$12 sps:$4 sm:$0xff]   ;;  %v6389_v33 = vld [vmem:[#allocation8 + $0x49c] ss:$12 sps:$4 sm:$0xff]  }
 0x21a   :  { %5565 = vmatprep.subr.bf16.mxu1 %v6321_v57  ;;  %v6374_v57 = vld [vmem:[#allocation8 + $0x454] ss:$12 sps:$4 sm:$0xff]  }
 0x21b   :  { %4497 = vmatpush1.bf16.msra.mxu0 %v6317_v22  ;;  %v6376_v22 = vld [vmem:[#allocation8 + $0x458] ss:$12 sps:$4 sm:$0xff]  }
 0x21c   :  { %4498 = vmatprep.subr.bf16.mxu0 %v6324_v23  ;;  %v6372_v23 = vld [vmem:[#allocation8 + $0x450] ss:$12 sps:$4 sm:$0xff]  }
 0x21d   :  { %5566 = vmatpush3.bf16.msra.mxu1 %v6325_v25  ;;  %v6380_v25 = vld [vmem:[#allocation8 + $0x398] ss:$12 sps:$4 sm:$0xff]  }
 0x21e   :  { %5567 = vmatprep.subr.bf16.mxu1 %v6326_v29  ;;  %v6384_v29 = vld [vmem:[#allocation8 + $0x484] ss:$12 sps:$4 sm:$0xff]  }
 0x21f   :  { %4499 = vmatpush1.bf16.msra.mxu0 %v6322_v32  ;;  %v6382_v32 = vld [vmem:[#allocation8 + $0x480] ss:$12 sps:$4 sm:$0xff]  }
 0x220   :  { %4500 = vmatprep.subr.bf16.mxu0 %v6329_v37  ;;  %v6387_v37 = vld [vmem:[#allocation8 + $0x498] ss:$12 sps:$4 sm:$0xff]  }
 0x221   :  { %5568 = vmatpush3.bf16.msra.mxu1 %v6330_v39  ;;  %v6396_v39 = vld [vmem:[#allocation8 + $0x578] ss:$12 sps:$4 sm:$0xff]  }
 0x222   :  { %5569 = vmatprep.subr.bf16.mxu1 %v6331_v45  ;;  %v6399_v45 = vld [vmem:[#allocation8 + $0x4cc] ss:$12 sps:$4 sm:$0xff]  }
 0x223   :  { %4501 = vmatpush1.bf16.msra.mxu0 %v6327_v46  ;;  %v6401_v46 = vld [vmem:[#allocation8 + $0x590] ss:$12 sps:$4 sm:$0xff]  }
 0x224   :  { %4502 = vmatprep.subr.bf16.mxu0 %v6334_v49  ;;  %v6397_v49 = vld [vmem:[#allocation8 + $0x4c8] ss:$12 sps:$4 sm:$0xff]  }
 0x225   :  { %5570 = vmatpush3.bf16.msra.mxu1 %v6335_v52  ;;  %v6404_v52 = vld [vmem:[#allocation8 + $0x4e4] ss:$12 sps:$4 sm:$0xff]  }
 0x226   :  { %5571 = vmatprep.subr.bf16.mxu1 %v6336_v53  ;;  %v6406_v53 = vld [vmem:[#allocation8 + $0x5a8] ss:$12 sps:$4 sm:$0xff]  }
 0x227   :  { %4503 = vmatpush1.bf16.msra.mxu0 %v6332_v54  ;;  %v6402_v54 = vld [vmem:[#allocation8 + $0x4e0] ss:$12 sps:$4 sm:$0xff]  }
 0x228   :  { %4504 = vmatprep.subr.bf16.mxu0 %v6339_v55  ;;  %v6409_v55 = vld [vmem:[#allocation8 + $0x4fc] ss:$12 sps:$4 sm:$0xff]  }
 0x229   :  { %5572 = vmatpush3.bf16.msra.mxu1 %v6340_v56  ;;  %v425_v56 = vsub.s32 6, %v6900_v40 }
 0x22a   :  { %5573 = vmatprep.subr.bf16.mxu1 %v6341_v58  ;;  %v6410_v58 = vld [vmem:[#allocation8 + $0x4e8] ss:$12 sps:$4 sm:$0xff]  }
 0x22b   :  { %4505 = vmatpush1.bf16.msra.mxu0 %v6337_v59  ;;  %v429_v59 = vsub.s32 7, %v6900_v40  ;;  %v6529_v40 = vld [vmem:[#allocation8 + $0x784] ss:$12 sps:$4 sm:$0xff]  }
 0x22c   :  { %4506 = vmatprep.subr.bf16.mxu0 %v6344_v60  ;;  %v6411_v60 = vld [vmem:[#allocation8 + $0x5c0] ss:$12 sps:$4 sm:$0xff]  }
 0x22d   :  { %5574 = vmatpush3.bf16.msra.mxu1 %v6345_v61  ;;  %v6407_v61 = vld [vmem:[#allocation8 + $0x4f8] ss:$12 sps:$4 sm:$0xff]  }
 0x22e   :  { %5581 = vmatprep.subr.bf16.mxu1 %v6346_v62  ;;  %v6578_v62 = vld [vmem:[#allocation7] sm:$0xff] }
 0x22f   :  { %4507 = vmatpush1.bf16.msra.mxu0 %v6342_v0  ;;  %v426_v0 = vrot.slane %v6578_v62, %v425_v56  ;;  %v6456_v56 = vld [vmem:[#allocation8 + $0x758] ss:$12 sps:$4 sm:$0xff]  }
 0x230   :  { %4736 = vmatmul.mubr.bf16.vlgmr.msra.gmra.mrb[20].mxu1 %v6941_v4  ;;  %4508 = vmatprep.subr.bf16.mxu0 %v6349_v1  ;;  %v6364_v4 = vld [vmem:[#allocation8 + $0x424] ss:$12 sps:$4 sm:$0xff]   ;;  %v6414_v1 = vld [vmem:[#allocation8 + $0x514] ss:$12 sps:$4 sm:$0xff]  }
 0x231   :  { %5582 = vmatpush3.bf16.msra.mxu1 %v6350_v2  ;;  %4776 = vmatprep.mubr.bf16.mxu1 %v6926_v51  ;;  %v6362_v51 = vld [vmem:[#allocation8 + $0x420] ss:$12 sps:$4 sm:$0xff]   ;;  %v430_v2 = vrot.slane %v6578_v62, %v429_v59  ;;  %v6457_v62 = vld [vmem:[#allocation8 + $0x5e8] ss:$12 sps:$4 sm:$0xff]  }
 0x232   :  { %5583 = vmatprep.subr.bf16.mxu1 %v6351_v3  ;;  %v6415_v3 = vld [vmem:[#allocation8 + $0x500] ss:$12 sps:$4 sm:$0xff]  }
 0x233   :  { %4509 = vmatpush1.bf16.msra.mxu0 %v6347_v43  ;;  %v6416_v43 = vld [vmem:[#allocation8 + $0x5d8] ss:$12 sps:$4 sm:$0xff]  }
 0x234   :  { %4510 = vmatprep.subr.bf16.mxu0 %v6354_v5  ;;  %v6459_v59 = vld [vmem:[#allocation8 + $0x5ec] ss:$12 sps:$4 sm:$0xff]  }
 0x235   :  { %5584 = vmatpush3.bf16.msra.mxu1 %v6355_v8  ;;  %v6412_v8 = vld [vmem:[#allocation8 + $0x510] ss:$12 sps:$4 sm:$0xff]  }
 0x236   :  { %5585 = vmatprep.subr.bf16.mxu1 %v6356_v9 }
 0x237   :  { %4511 = vmatpush1.bf16.msra.mxu0 %v6352_v10 }
 0x238   :  { %4512 = vmatprep.subr.bf16.mxu0 %v6359_v11  ;;  %v6419_v11 = vld [vmem:[#allocation8 + $0x52c] ss:$12 sps:$4 sm:$0xff]  }
 0x239   :  { %5586 = vmatpush3.bf16.msra.mxu1 %v6360_v12 }
 0x23a   :  { %5587 = vmatprep.subr.bf16.mxu1 %v6361_v13 }
 0x23b   :  { %4513 = vmatpush1.bf16.msra.mxu0 %v6357_v14  ;;  %v6420_v14 = vld [vmem:[#allocation8 + $0x518] ss:$12 sps:$4 sm:$0xff]  }
 0x23c   :  { %4514 = vmatprep.subr.bf16.mxu0 %v6364_v4 }
 0x23d   :  { %5588 = vmatpush3.bf16.msra.mxu1 %v6365_v7 }
 0x23e   :  { %5589 = vmatprep.subr.bf16.mxu1 %v6366_v15 }
 0x23f   :  { %4515 = vmatpush1.bf16.msra.mxu0 %v6362_v51  ;;  %v6421_v51 = vld [vmem:[#allocation8 + $0x5f0] ss:$12 sps:$4 sm:$0xff]  }
 0x240   :  { %4516 = vmatprep.subr.bf16.mxu0 %v6369_v63 }
 0x241   :  { %5590 = vmatpush3.bf16.msra.mxu1 %v6370_v17  ;;  %v6417_v17 = vld [vmem:[#allocation8 + $0x528] ss:$12 sps:$4 sm:$0xff]  }
 0x242   :  { %5591 = vmatprep.subr.bf16.mxu1 %v6371_v19 }
 0x243   :  { %4517 = vmatpush1.bf16.msra.mxu0 %v6367_v20  ;;  %v6424_v20 = vld [vmem:[#allocation8 + $0x544] ss:$12 sps:$4 sm:$0xff]  }
 0x244   :  { %4518 = vmatprep.subr.bf16.mxu0 %v6374_v57 }
 0x245   :  { %5592 = vmatpush3.bf16.msra.mxu1 %v6375_v21 }
 0x246   :  { %5593 = vmatprep.subr.bf16.mxu1 %v6376_v22  ;;  %v6425_v22 = vld [vmem:[#allocation8 + $0x530] ss:$12 sps:$4 sm:$0xff]  }
 0x247   :  { %4519 = vmatpush1.bf16.msra.mxu0 %v6372_v23 }
 0x248   :  { %4520 = vmatprep.subr.bf16.mxu0 %v6379_v24  ;;  %v6426_v24 = vld [vmem:[#allocation8 + $0x6c8] ss:$12 sps:$4 sm:$0xff]  }
 0x249   :  { %5594 = vmatpush3.bf16.msra.mxu1 %v6380_v25 }
 0x24a   :  { %5595 = vmatprep.subr.bf16.mxu1 %v6381_v26  ;;  %v6422_v26 = vld [vmem:[#allocation8 + $0x540] ss:$12 sps:$4 sm:$0xff]  }
 0x24b   :  { %4521 = vmatpush1.bf16.msra.mxu0 %v6377_v27  ;;  %v6429_v27 = vld [vmem:[#allocation8 + $0x55c] ss:$12 sps:$4 sm:$0xff]  }
 0x24c   :  { %4533 = vmatprep.subr.bf16.mxu0 %v6384_v29  ;;  %v6430_v29 = vld [vmem:[#allocation8 + $0x608] ss:$12 sps:$4 sm:$0xff]  }
 0x24d   :  { %5596 = vmatpush3.bf16.msra.mxu1 %v6385_v30  ;;  %v6431_v30 = vld [vmem:[#allocation8 + $0x6e0] ss:$12 sps:$4 sm:$0xff]  }
 0x24e   :  { %4523 = vmatmul.mubr.bf16.vlgmr.msra.gmra.mrb[8].mxu0 %v6924_v48  ;;  %5603 = vmatprep.subr.bf16.mxu1 %v6386_v31  ;;  %v6427_v31 = vld [vmem:[#allocation8 + $0x558] ss:$12 sps:$4 sm:$0xff]  }
 0x24f   :  { %4534 = vmatpush1.bf16.msra.mxu0 %v6382_v32  ;;  %v6434_v32 = vld [vmem:[#allocation8 + $0x574] ss:$12 sps:$4 sm:$0xff]  }
 0x250   :  { %4777 = vmatmul.mubr.bf16.vlgmr.msra.gmra.mrb[24].mxu1 %v6924_v48  ;;  %4535 = vmatprep.subr.bf16.mxu0 %v6389_v33  ;;  %v6405_v48 = vld [vmem:[#allocation8 + $0x4d0] ss:$12 sps:$4 sm:$0xff]   ;;  %v6435_v33 = vld [vmem:[#allocation8 + $0x620] ss:$12 sps:$4 sm:$0xff]  }
 0x251   :  { %5604 = vmatpush3.bf16.msra.mxu1 %v6390_v35  ;;  %v6436_v35 = vld [vmem:[#allocation8 + $0x6f8] ss:$12 sps:$4 sm:$0xff]  }
 0x252   :  { %5605 = vmatprep.subr.bf16.mxu1 %v6391_v36  ;;  %v6432_v36 = vld [vmem:[#allocation8 + $0x570] ss:$12 sps:$4 sm:$0xff]  }
 0x253   :  { %4536 = vmatpush1.bf16.msra.mxu0 %v6387_v37  ;;  %v6439_v37 = vld [vmem:[#allocation8 + $0x58c] ss:$12 sps:$4 sm:$0xff]  }
 0x254   :  { %4537 = vmatprep.subr.bf16.mxu0 %v6394_v28  ;;  %v6440_v28 = vld [vmem:[#allocation8 + $0x638] ss:$12 sps:$4 sm:$0xff]  }
 0x255   :  { %5606 = vmatpush3.bf16.msra.mxu1 %v6395_v38  ;;  %v6441_v38 = vld [vmem:[#allocation8 + $0x710] ss:$12 sps:$4 sm:$0xff]  }
 0x256   :  { %5607 = vmatprep.subr.bf16.mxu1 %v6396_v39  ;;  %v6437_v39 = vld [vmem:[#allocation8 + $0x588] ss:$12 sps:$4 sm:$0xff]  }
 0x257   :  { %4538 = vmatpush1.bf16.msra.mxu0 %v6392_v41  ;;  %v6444_v41 = vld [vmem:[#allocation8 + $0x5a4] ss:$12 sps:$4 sm:$0xff]  }
 0x258   :  { %4539 = vmatprep.subr.bf16.mxu0 %v6399_v45  ;;  %v6445_v45 = vld [vmem:[#allocation8 + $0x650] ss:$12 sps:$4 sm:$0xff]  }
 0x259   :  { %5608 = vmatpush3.bf16.msra.mxu1 %v6400_v18  ;;  %v6446_v18 = vld [vmem:[#allocation8 + $0x728] ss:$12 sps:$4 sm:$0xff]  }
 0x25a   :  { %5609 = vmatprep.subr.bf16.mxu1 %v6401_v46  ;;  %v6442_v46 = vld [vmem:[#allocation8 + $0x5a0] ss:$12 sps:$4 sm:$0xff]  }
 0x25b   :  { %4540 = vmatpush1.bf16.msra.mxu0 %v6397_v49  ;;  %v6449_v49 = vld [vmem:[#allocation8 + $0x5bc] ss:$12 sps:$4 sm:$0xff]  }
 0x25c   :  { %4541 = vmatprep.subr.bf16.mxu0 %v6404_v52  ;;  %v6450_v52 = vld [vmem:[#allocation8 + $0x668] ss:$12 sps:$4 sm:$0xff]  }
 0x25d   :  { %5610 = vmatpush3.bf16.msra.mxu1 %v6405_v48  ;;  %v6451_v48 = vld [vmem:[#allocation8 + $0x740] ss:$12 sps:$4 sm:$0xff]  }
 0x25e   :  { %5611 = vmatprep.subr.bf16.mxu1 %v6406_v53  ;;  %v6447_v53 = vld [vmem:[#allocation8 + $0x5b8] ss:$12 sps:$4 sm:$0xff]  }
 0x25f   :  { %4542 = vmatpush1.bf16.msra.mxu0 %v6402_v54  ;;  %v6454_v54 = vld [vmem:[#allocation8 + $0x5d4] ss:$12 sps:$4 sm:$0xff]  }
 0x260   :  { %4543 = vmatprep.subr.bf16.mxu0 %v6409_v55  ;;  %v6455_v55 = vld [vmem:[#allocation8 + $0x680] ss:$12 sps:$4 sm:$0xff]  }
 0x261   :  { %5612 = vmatpush3.bf16.msra.mxu1 %v6410_v58  ;;  %v6452_v58 = vld [vmem:[#allocation8 + $0x5d0] ss:$12 sps:$4 sm:$0xff]  }
 0x262   :  { %5613 = vmatprep.subr.bf16.mxu1 %v6411_v60  ;;  %v6460_v60 = vld [vmem:[#allocation8 + $0x698] ss:$12 sps:$4 sm:$0xff]  }
 0x263   :  { %4544 = vmatpush1.bf16.msra.mxu0 %v6407_v61  ;;  %v2250_v5 = vpop.f32.mrb[8].mxu1  ;;  %v6461_v61 = vld [vmem:[#allocation8 + $0x770] ss:$12 sps:$4 sm:$0xff]  }
 0x264   :  { %v5681_v9 = vadd.f32 %v2250_v5, %v426_v0  ;;  %v2252_v10 = vpop.f32.mrb[9].mxu1  ;;  %4545 = vmatprep.subr.bf16.mxu0 %v6414_v1  ;;  %v6465_v1 = vld [vmem:[#allocation8 + $0x6b0] ss:$12 sps:$4 sm:$0xff]   ;;  %v6491_v5 = vld [vmem:[#allocation8 + $0x788] ss:$12 sps:$4 sm:$0xff]  }
 0x265   :  { %v5682_v12 = vadd.f32 %v2252_v10, %v430_v2  ;;  %v2254_v13 = vpop.f32.mrb[10].mxu1  ;;  %5614 = vmatpush3.bf16.msra.mxu1 %v6415_v3  ;;  %v6462_v3 = vld [vmem:[#allocation8 + $0x600] ss:$12 sps:$4 sm:$0xff]  }
 0x266   :  { %v2437_v4 = vmax.f32 %v5681_v9, 0.0  ;;  %v5683_v7 = vadd.f32 %v2254_v13, %v426_v0  ;;  %v2256_v15 = vpop.f32.mrb[11].mxu1  ;;  %5615 = vmatprep.subr.bf16.mxu1 %v6416_v43  ;;  %v6464_v0 = vld [vmem:[#allocation8 + $0x604] ss:$12 sps:$4 sm:$0xff]   ;;  %v6468_v43 = vld [vmem:[#allocation8 + $0x61c] ss:$12 sps:$4 sm:$0xff]  }
 0x267   :  { %v5684_v63 = vadd.f32 %v2256_v15, %v430_v2  ;;  %4546 = vmatpush1.bf16.msra.mxu0 %v6412_v8  ;;  %v2438_v57 = vmax.f32 %v5682_v12, 0.0  ;;  %v6490_v2 = vld [vmem:[#allocation8 + $0x848] ss:$12 sps:$4 sm:$0xff]   ;;  %v6495_v8 = vld [vmem:[#allocation8 + $0x860] ss:$12 sps:$4 sm:$0xff]  }
 0x268   :  { %v2449_v19 = vmax.f32 %v5683_v7, 0.0  ;;  %4547 = vmatprep.subr.bf16.mxu0 %v6419_v11  ;;  %v6466_v9 = vld [vmem:[#allocation8 + $0x618] ss:$12 sps:$4 sm:$0xff]   ;;  %v6471_v10 = vld [vmem:[#allocation8 + $0x634] ss:$12 sps:$4 sm:$0xff]  }
 0x269   :  { %v2450_v21 = vmax.f32 %v5684_v63, 0.0  ;;  %5616 = vmatpush3.bf16.msra.mxu1 %v6420_v14  ;;  %v6496_v11 = vld [vmem:[#allocation8 + $0x7a0] ss:$12 sps:$4 sm:$0xff]   ;;  %v6500_v12 = vld [vmem:[#allocation8 + $0x878] ss:$12 sps:$4 sm:$0xff]  }
 0x26a   :  { %v6962_v23 = vpack.c.bf16 %v2449_v19, %v2437_v4  ;;  %5617 = vmatprep.subr.bf16.mxu1 %v6421_v51  ;;  %v6469_v13 = vld [vmem:[#allocation8 + $0x630] ss:$12 sps:$4 sm:$0xff]   ;;  %v6474_v14 = vld [vmem:[#allocation8 + $0x64c] ss:$12 sps:$4 sm:$0xff]   ;;  %v6472_v15 = vld [vmem:[#allocation8 + $0x648] ss:$12 sps:$4 sm:$0xff]  }
 0x26b   :  { %v2462_v25 = vpack.c.bf16 %v2450_v21, %v2438_v57  ;;  %4548 = vmatpush1.bf16.msra.mxu0 %v6417_v17  ;;  %v6501_v4 = vld [vmem:[#allocation8 + $0x7b8] ss:$12 sps:$4 sm:$0xff]   ;;  %v6505_v7 = vld [vmem:[#allocation8 + $0x890] ss:$12 sps:$4 sm:$0xff]   ;;  %v6510_v63 = vld [vmem:[#allocation8 + $0x8a8] ss:$12 sps:$4 sm:$0xff]  }
 0x26c   :  { %4549 = vmatprep.subr.bf16.mxu0 %v6424_v20  ;;  %v6506_v51 = vld [vmem:[#allocation8 + $0x7d0] ss:$12 sps:$4 sm:$0xff]   ;;  %v6475_v17 = vld [vmem:[#allocation8 + $0x660] ss:$12 sps:$4 sm:$0xff]   ;;  %v6511_v20 = vld [vmem:[#allocation8 + $0x7e8] ss:$12 sps:$4 sm:$0xff]  }
 0x26d   :  { %4565 = vmatprep.mubr.bf16.mxu0 %v2462_v25  ;;  %5618 = vmatpush3.bf16.msra.mxu1 %v6425_v22  ;;  %v6480_v19 = vld [vmem:[#allocation8 + $0x67c] ss:$12 sps:$4 sm:$0xff]   ;;  %v6515_v57 = vld [vmem:[#allocation8 + $0x8c0] ss:$12 sps:$4 sm:$0xff]   ;;  %v6478_v21 = vld [vmem:[#allocation8 + $0x678] ss:$12 sps:$4 sm:$0xff]  }
 0x26e   :  { %4817 = vmatprep.mubr.bf16.mxu1 %v2462_v25  ;;  %5625 = vmatprep.subr.bf16.mxu1 %v6426_v24  ;;  %v6483_v22 = vld [vmem:[#allocation8 + $0x694] ss:$12 sps:$4 sm:$0xff]   ;;  %v6520_v24 = vld [vmem:[#allocation8 + $0x8d8] ss:$12 sps:$4 sm:$0xff]   ;;  %v6481_v25 = vld [vmem:[#allocation8 + $0x690] ss:$12 sps:$4 sm:$0xff]  }
 0x26f   :  { %4550 = vmatpush1.bf16.msra.mxu0 %v6422_v26  ;;  %v6486_v26 = vld [vmem:[#allocation8 + $0x6ac] ss:$12 sps:$4 sm:$0xff]  }
 0x270   :  { %4818 = vmatmul.mubr.bf16.vlgmr.msra.gmra.mrb[28].mxu1 %v6962_v23  ;;  %4551 = vmatprep.subr.bf16.mxu0 %v6429_v27  ;;  %v6521_v27 = vld [vmem:[#allocation8 + $0x818] ss:$12 sps:$4 sm:$0xff]  }
 0x271   :  { %5626 = vmatpush3.bf16.msra.mxu1 %v6430_v29  ;;  %4858 = vmatprep.mubr.bf16.mxu1 %v6954_v50  ;;  %v6525_v29 = vld [vmem:[#allocation8 + $0x8f0] ss:$12 sps:$4 sm:$0xff]  }
 0x272   :  { %5627 = vmatprep.subr.bf16.mxu1 %v6431_v30  ;;  %v6484_v30 = vld [vmem:[#allocation8 + $0x6a8] ss:$12 sps:$4 sm:$0xff]  }
 0x273   :  { %4552 = vmatpush1.bf16.msra.mxu0 %v6427_v31  ;;  %v6489_v31 = vld [vmem:[#allocation8 + $0x6c4] ss:$12 sps:$4 sm:$0xff]  }
 0x274   :  { %4553 = vmatprep.subr.bf16.mxu0 %v6434_v32  ;;  %v6526_v32 = vld [vmem:[#allocation8 + $0x830] ss:$12 sps:$4 sm:$0xff]  }
 0x275   :  { %5628 = vmatpush3.bf16.msra.mxu1 %v6435_v33  ;;  %v6487_v33 = vld [vmem:[#allocation8 + $0x6c0] ss:$12 sps:$4 sm:$0xff]  }
 0x276   :  { %5629 = vmatprep.subr.bf16.mxu1 %v6436_v35  ;;  %v6494_v35 = vld [vmem:[#allocation8 + $0x6dc] ss:$12 sps:$4 sm:$0xff]  }
 0x277   :  { %4554 = vmatpush1.bf16.msra.mxu0 %v6432_v36  ;;  %v6492_v36 = vld [vmem:[#allocation8 + $0x6d8] ss:$12 sps:$4 sm:$0xff]  }
 0x278   :  { %4555 = vmatprep.subr.bf16.mxu0 %v6439_v37  ;;  %v6499_v37 = vld [vmem:[#allocation8 + $0x6f4] ss:$12 sps:$4 sm:$0xff]  }
 0x279   :  { %5630 = vmatpush3.bf16.msra.mxu1 %v6440_v28  ;;  %v6497_v28 = vld [vmem:[#allocation8 + $0x6f0] ss:$12 sps:$4 sm:$0xff]  }
 0x27a   :  { %5631 = vmatprep.subr.bf16.mxu1 %v6441_v38  ;;  %v6504_v38 = vld [vmem:[#allocation8 + $0x70c] ss:$12 sps:$4 sm:$0xff]  }
 0x27b   :  { %4556 = vmatpush1.bf16.msra.mxu0 %v6437_v39  ;;  %v6502_v39 = vld [vmem:[#allocation8 + $0x708] ss:$12 sps:$4 sm:$0xff]  }
 0x27c   :  { %4557 = vmatprep.subr.bf16.mxu0 %v6444_v41  ;;  %v6509_v41 = vld [vmem:[#allocation8 + $0x724] ss:$12 sps:$4 sm:$0xff]  }
 0x27d   :  { %5632 = vmatpush3.bf16.msra.mxu1 %v6445_v45  ;;  %v6507_v45 = vld [vmem:[#allocation8 + $0x720] ss:$12 sps:$4 sm:$0xff]  }
 0x27e   :  { %5633 = vmatprep.subr.bf16.mxu1 %v6446_v18  ;;  %v6514_v18 = vld [vmem:[#allocation8 + $0x73c] ss:$12 sps:$4 sm:$0xff]  }
 0x27f   :  { %4558 = vmatpush1.bf16.msra.mxu0 %v6442_v46  ;;  %v6512_v46 = vld [vmem:[#allocation8 + $0x738] ss:$12 sps:$4 sm:$0xff]  }
 0x280   :  { %4559 = vmatprep.subr.bf16.mxu0 %v6449_v49  ;;  %v442_v49 = vrot.slane %v6946_v16, %v6933_v42 }
 0x281   :  { %5634 = vmatpush3.bf16.msra.mxu1 %v6450_v52  ;;  %v6519_v52 = vld [vmem:[#allocation8 + $0x754] ss:$12 sps:$4 sm:$0xff]  }
 0x282   :  { %5635 = vmatprep.subr.bf16.mxu1 %v6451_v48  ;;  %v446_v48 = vrot.slane %v6946_v16, %v413_v34 }
 0x283   :  { %4560 = vmatpush1.bf16.msra.mxu0 %v6447_v53 }
 0x284   :  { %4561 = vmatprep.subr.bf16.mxu0 %v6454_v54  ;;  %v6517_v54 = vld [vmem:[#allocation8 + $0x750] ss:$12 sps:$4 sm:$0xff]  }
 0x285   :  { %5636 = vmatpush3.bf16.msra.mxu1 %v6455_v55 }
 0x286   :  { %5637 = vmatprep.subr.bf16.mxu1 %v6456_v56 }
 0x287   :  { %4562 = vmatpush1.bf16.msra.mxu0 %v6452_v58  ;;  %v6524_v58 = vld [vmem:[#allocation8 + $0x76c] ss:$12 sps:$4 sm:$0xff]  }
 0x288   :  { %4563 = vmatprep.subr.bf16.mxu0 %v6459_v59 }
 0x289   :  { %5638 = vmatpush3.bf16.msra.mxu1 %v6460_v60 }
 0x28a   :  { %5639 = vmatprep.subr.bf16.mxu1 %v6461_v61 }
 0x28b   :  { %4564 = vmatpush1.bf16.msra.mxu0 %v6457_v62 }
 0x28c   :  { %4576 = vmatprep.subr.bf16.mxu0 %v6464_v0 }
 0x28d   :  { %5640 = vmatpush3.bf16.msra.mxu1 %v6465_v1 }
 0x28e   :  { %4566 = vmatmul.mubr.bf16.vlgmr.msra.gmra.mrb[8].mxu0 %v6962_v23  ;;  %5647 = vmatprep.subr.bf16.mxu1 %v6490_v2  ;;  %v6516_v23 = vld [vmem:[#allocation8 + $0x800] ss:$12 sps:$4 sm:$0xff]  }
 0x28f   :  { %4577 = vmatpush1.bf16.msra.mxu0 %v6462_v3  ;;  %4608 = vmatprep.mubr.bf16.mxu0 %v6954_v50  ;;  %v6477_v50 = vld [vmem:[#allocation8 + $0x664] ss:$12 sps:$4 sm:$0xff]   ;;  %v6522_v3 = vld [vmem:[#allocation8 + $0x768] ss:$12 sps:$4 sm:$0xff]  }
 0x290   :  { %4859 = vmatmul.mubr.bf16.vlgmr.msra.gmra.mrb[32].mxu1 %v6952_v47  ;;  %4578 = vmatprep.subr.bf16.mxu0 %v6468_v43 }
 0x291   :  { %5648 = vmatpush3.bf16.msra.mxu1 %v6491_v5 }
 0x292   :  { %5649 = vmatprep.subr.bf16.mxu1 %v6495_v8  ;;  %v6527_v8 = vld [vmem:[#allocation8 + $0x780] ss:$12 sps:$4 sm:$0xff]  }
 0x293   :  { %4579 = vmatpush1.bf16.msra.mxu0 %v6466_v9  ;;  %v6532_v9 = vld [vmem:[#allocation8 + $0x79c] ss:$12 sps:$4 sm:$0xff]  }
 0x294   :  { %4580 = vmatprep.subr.bf16.mxu0 %v6471_v10  ;;  %v6530_v10 = vld [vmem:[#allocation8 + $0x798] ss:$12 sps:$4 sm:$0xff]  }
 0x295   :  { %5650 = vmatpush3.bf16.msra.mxu1 %v6496_v11  ;;  %v6535_v11 = vld [vmem:[#allocation8 + $0x7b4] ss:$12 sps:$4 sm:$0xff]  }
 0x296   :  { %5651 = vmatprep.subr.bf16.mxu1 %v6500_v12  ;;  %v6533_v12 = vld [vmem:[#allocation8 + $0x7b0] ss:$12 sps:$4 sm:$0xff]  }
 0x297   :  { %4581 = vmatpush1.bf16.msra.mxu0 %v6469_v13  ;;  %v6538_v13 = vld [vmem:[#allocation8 + $0x7cc] ss:$12 sps:$4 sm:$0xff]  }
 0x298   :  { %4582 = vmatprep.subr.bf16.mxu0 %v6474_v14  ;;  %v6536_v14 = vld [vmem:[#allocation8 + $0x7c8] ss:$12 sps:$4 sm:$0xff]  }
 0x299   :  { %5652 = vmatpush3.bf16.msra.mxu1 %v6501_v4  ;;  %v6541_v4 = vld [vmem:[#allocation8 + $0x7e4] ss:$12 sps:$4 sm:$0xff]  }
 0x29a   :  { %5653 = vmatprep.subr.bf16.mxu1 %v6505_v7  ;;  %v6539_v7 = vld [vmem:[#allocation8 + $0x7e0] ss:$12 sps:$4 sm:$0xff]  }
 0x29b   :  { %4583 = vmatpush1.bf16.msra.mxu0 %v6472_v15  ;;  %v6544_v15 = vld [vmem:[#allocation8 + $0x7fc] ss:$12 sps:$4 sm:$0xff]  }
 0x29c   :  { %4584 = vmatprep.subr.bf16.mxu0 %v6477_v50  ;;  %v6547_v50 = vld [vmem:[#allocation8 + $0x814] ss:$12 sps:$4 sm:$0xff]  }
 0x29d   :  { %5654 = vmatpush3.bf16.msra.mxu1 %v6506_v51 }
 0x29e   :  { %5655 = vmatprep.subr.bf16.mxu1 %v6510_v63  ;;  %v6545_v63 = vld [vmem:[#allocation8 + $0x810] ss:$12 sps:$4 sm:$0xff]  }
 0x29f   :  { %4585 = vmatpush1.bf16.msra.mxu0 %v6475_v17 }
 0x2a0   :  { %4586 = vmatprep.subr.bf16.mxu0 %v6480_v19  ;;  %v6550_v19 = vld [vmem:[#allocation8 + $0x82c] ss:$12 sps:$4 sm:$0xff]  }
 0x2a1   :  { %5656 = vmatpush3.bf16.msra.mxu1 %v6511_v20 }
 0x2a2   :  { %5657 = vmatprep.subr.bf16.mxu1 %v6515_v57 }
 0x2a3   :  { %4587 = vmatpush1.bf16.msra.mxu0 %v6478_v21 }
 0x2a4   :  { %4588 = vmatprep.subr.bf16.mxu0 %v6483_v22 }
 0x2a5   :  { %5658 = vmatpush3.bf16.msra.mxu1 %v6516_v23  ;;  %v6548_v23 = vld [vmem:[#allocation8 + $0x828] ss:$12 sps:$4 sm:$0xff]  }
 0x2a6   :  { %5659 = vmatprep.subr.bf16.mxu1 %v6520_v24  ;;  %v6553_v24 = vld [vmem:[#allocation8 + $0x844] ss:$12 sps:$4 sm:$0xff]  }
 0x2a7   :  { %4589 = vmatpush1.bf16.msra.mxu0 %v6481_v25  ;;  %v6551_v25 = vld [vmem:[#allocation8 + $0x840] ss:$12 sps:$4 sm:$0xff]  }
 0x2a8   :  { %4590 = vmatprep.subr.bf16.mxu0 %v6486_v26  ;;  %v6556_v26 = vld [vmem:[#allocation8 + $0x85c] ss:$12 sps:$4 sm:$0xff]  }
 0x2a9   :  { %5660 = vmatpush3.bf16.msra.mxu1 %v6521_v27  ;;  %v6554_v27 = vld [vmem:[#allocation8 + $0x858] ss:$12 sps:$4 sm:$0xff]  }
 0x2aa   :  { %5661 = vmatprep.subr.bf16.mxu1 %v6525_v29  ;;  %v6559_v29 = vld [vmem:[#allocation8 + $0x874] ss:$12 sps:$4 sm:$0xff]  }
 0x2ab   :  { %4591 = vmatpush1.bf16.msra.mxu0 %v6484_v30  ;;  %v6557_v30 = vld [vmem:[#allocation8 + $0x870] ss:$12 sps:$4 sm:$0xff]  }
 0x2ac   :  { %4592 = vmatprep.subr.bf16.mxu0 %v6489_v31  ;;  %v6562_v31 = vld [vmem:[#allocation8 + $0x88c] ss:$12 sps:$4 sm:$0xff]  }
 0x2ad   :  { %5662 = vmatpush3.bf16.msra.mxu1 %v6526_v32  ;;  %v6560_v32 = vld [vmem:[#allocation8 + $0x888] ss:$12 sps:$4 sm:$0xff]  }
 0x2af   :  { %4593 = vmatpush1.bf16.msra.mxu0 %v6487_v33  ;;  %v6565_v33 = vld [vmem:[#allocation8 + $0x8a4] ss:$12 sps:$4 sm:$0xff]  }
 0x2b0   :  { %4594 = vmatprep.subr.bf16.mxu0 %v6494_v35  ;;  %v6563_v35 = vld [vmem:[#allocation8 + $0x8a0] ss:$12 sps:$4 sm:$0xff]  }
 0x2b3   :  { %4595 = vmatpush1.bf16.msra.mxu0 %v6492_v36  ;;  %v6568_v36 = vld [vmem:[#allocation8 + $0x8bc] ss:$12 sps:$4 sm:$0xff]  }
 0x2b4   :  { %4596 = vmatprep.subr.bf16.mxu0 %v6499_v37  ;;  %v6978_v37 = vld [vmem:[#allocation10] sm:$0x7] }
 0x2b7   :  { %4597 = vmatpush1.bf16.msra.mxu0 %v6497_v28  ;;  %v6566_v28 = vld [vmem:[#allocation8 + $0x8b8] ss:$12 sps:$4 sm:$0xff]  }
 0x2b8   :  { %4598 = vmatprep.subr.bf16.mxu0 %v6504_v38  ;;  %v6571_v38 = vld [vmem:[#allocation8 + $0x8d4] ss:$12 sps:$4 sm:$0xff]  }
 0x2bb   :  { %4599 = vmatpush1.bf16.msra.mxu0 %v6502_v39  ;;  %v2864_v39 = vrot.slane %v6978_v37, %v6933_v42 }
 0x2bc   :  { %4600 = vmatprep.subr.bf16.mxu0 %v6509_v41 }
 0x2bf   :  { %4601 = vmatpush1.bf16.msra.mxu0 %v6507_v45  ;;  %v6569_v45 = vld [vmem:[#allocation8 + $0x8d0] ss:$12 sps:$4 sm:$0xff]  }
 0x2c0   :  { %4602 = vmatprep.subr.bf16.mxu0 %v6514_v18 }
 0x2c3   :  { %4603 = vmatpush1.bf16.msra.mxu0 %v6512_v46  ;;  %v2422_v53 = vpop.f32.mrb[12].mxu1  ;;  %v6574_v46 = vld [vmem:[#allocation8 + $0x8ec] ss:$12 sps:$4 sm:$0xff]  }
 0x2c4   :  { %v5689_v55 = vadd.f32 %v2422_v53, %v442_v49  ;;  %v2424_v56 = vpop.f32.mrb[13].mxu1  ;;  %4604 = vmatprep.subr.bf16.mxu0 %v6519_v52 }
 0x2c5   :  { %v5690_v59 = vadd.f32 %v2424_v56, %v446_v48  ;;  %v2426_v60 = vpop.f32.mrb[14].mxu1 }
 0x2c6   :  { %v2441_v61 = vmax.f32 %v5689_v55, 0.0  ;;  %v5691_v62 = vadd.f32 %v2426_v60, %v442_v49  ;;  %v2428_v0 = vpop.f32.mrb[15].mxu1 }
 0x2c7   :  { %v2442_v1 = vmax.f32 %v5690_v59, 0.0  ;;  %v5692_v2 = vadd.f32 %v2428_v0, %v446_v48  ;;  %4605 = vmatpush1.bf16.msra.mxu0 %v6517_v54 }
 0x2c8   :  { %v2453_v43 = vmax.f32 %v5691_v62, 0.0  ;;  %4606 = vmatprep.subr.bf16.mxu0 %v6524_v58  ;;  %v6572_v58 = vld [vmem:[#allocation8 + $0x8e8] ss:$12 sps:$4 sm:$0xff]  }
 0x2c9   :  { %v2454_v34 = vmax.f32 %v5692_v2, 0.0 }
 0x2ca   :  { %v6974_v16 = vpack.c.bf16 %v2453_v43, %v2441_v61 }
 0x2cb   :  { %v2466_v5 = vpack.c.bf16 %v2454_v34, %v2442_v1  ;;  %4607 = vmatpush1.bf16.msra.mxu0 %v6522_v3 }
 0x2cc   :  { %4619 = vmatprep.subr.bf16.mxu0 %v6529_v40 }
 0x2cd   :  { %4899 = vmatprep.mubr.bf16.mxu1 %v2466_v5 }
 0x2ce   :  { %4609 = vmatmul.mubr.bf16.vlgmr.msra.gmra.mrb[8].mxu0 %v6952_v47  ;;  %4900 = vmatmul.mubr.bf16.vlgmr.msra.gmra.mrb[36].mxu1 %v6974_v16  ;;  %v6542_v47 = vld [vmem:[#allocation8 + $0x7f8] ss:$12 sps:$4 sm:$0xff]  }
 0x2cf   :  { %4620 = vmatpush1.bf16.msra.mxu0 %v6527_v8  ;;  %4651 = vmatprep.mubr.bf16.mxu0 %v2466_v5 }
 0x2d0   :  { %4621 = vmatprep.subr.bf16.mxu0 %v6532_v9 }
 0x2d3   :  { %4622 = vmatpush1.bf16.msra.mxu0 %v6530_v10 }
 0x2d4   :  { %4623 = vmatprep.subr.bf16.mxu0 %v6535_v11 }
 0x2d7   :  { %4624 = vmatpush1.bf16.msra.mxu0 %v6533_v12 }
 0x2d8   :  { %4625 = vmatprep.subr.bf16.mxu0 %v6538_v13 }
 0x2db   :  { %4626 = vmatpush1.bf16.msra.mxu0 %v6536_v14 }
 0x2dc   :  { %4627 = vmatprep.subr.bf16.mxu0 %v6541_v4 }
 0x2df   :  { %4628 = vmatpush1.bf16.msra.mxu0 %v6539_v7 }
 0x2e0   :  { %4629 = vmatprep.subr.bf16.mxu0 %v6544_v15 }
 0x2e3   :  { %4630 = vmatpush1.bf16.msra.mxu0 %v6542_v47  ;;  %v5553_v51 = vpop.f32.mrb[16].mxu1 }
 0x2e4   :  { %v5554_v17 = vpop.f32.mrb[17].mxu1  ;;  %4631 = vmatprep.subr.bf16.mxu0 %v6547_v50 }
 0x2e5   :  { %v5555_v20 = vadd.f32 %v5554_v17, %v5553_v51  ;;  %v5556_v57 = vpop.f32.mrb[18].mxu1  ;;  %v4910_v17 = vld [vmem:[#allocation11 + $0x10] sm:$0xff] }
 0x2e6   :  { %v5557_v21 = vpop.f32.mrb[19].mxu1  ;;  %vm4916_vm0 = vcmp.ge.u32.totalorder %v4910_v17, 858993459 }
 0x2e7   :  { %4632 = vmatpush1.bf16.msra.mxu0 %v6545_v63  ;;  %v5558_v22 = vadd.f32 %v5557_v21, %v5556_v57  ;;  %v4697_v49 = vadd.f32 %v5555_v20, %v2864_v39 }
 0x2e8   :  { %4633 = vmatprep.subr.bf16.mxu0 %v6550_v19 }
 0x2e9   :  { %v4700_v54 = vadd.f32 %v5558_v22, %v2864_v39  ;;  %v4913_v22 = vld [vmem:[#allocation11 + $0x28] sm:$0xff] }
 0x2ea   :  { %vm4919_vm1 = vcmp.ge.u32.totalorder %v4913_v22, 858993459 }
 0x2eb   :  { %4634 = vmatpush1.bf16.msra.mxu0 %v6548_v23 }
 0x2ec   :  { %4635 = vmatprep.subr.bf16.mxu0 %v6553_v24 }
 0x2ef   :  { %4636 = vmatpush1.bf16.msra.mxu0 %v6551_v25 }
 0x2f0   :  { %4637 = vmatprep.subr.bf16.mxu0 %v6556_v26 }
 0x2f3   :  { %4638 = vmatpush1.bf16.msra.mxu0 %v6554_v27 }
 0x2f4   :  { %4639 = vmatprep.subr.bf16.mxu0 %v6559_v29  ;;  %v2856_v29 = vrot.slane %v6978_v37, %v6905_v44 }
 0x2f7   :  { %4640 = vmatpush1.bf16.msra.mxu0 %v6557_v30  ;;  %v2860_v30 = vrot.slane %v6978_v37, %v6908_v6 }
 0x2f8   :  { %4641 = vmatprep.subr.bf16.mxu0 %v6562_v31  ;;  %v4908_v31 = vld [vmem:[#allocation11] sm:$0xff] }
 0x2f9   :  { %vm4914_vm2 = vcmp.ge.u32.totalorder %v4908_v31, 858993459 }
 0x2fb   :  { %4642 = vmatpush1.bf16.msra.mxu0 %v6560_v32 }
 0x2fc   :  { %4643 = vmatprep.subr.bf16.mxu0 %v6565_v33  ;;  %v4909_v33 = vld [vmem:[#allocation11 + $0x8] sm:$0xff] }
 0x2fd   :  { %vm4915_vm3 = vcmp.ge.u32.totalorder %v4909_v33, 858993459 }
 0x2ff   :  { %4644 = vmatpush1.bf16.msra.mxu0 %v6563_v35 }
 0x300   :  { %4645 = vmatprep.subr.bf16.mxu0 %v6568_v36 }
 0x303   :  { %4646 = vmatpush1.bf16.msra.mxu0 %v6566_v28  ;;  %v5575_v41 = vpop.f32.mrb[20].mxu1  ;;  %v4911_v28 = vld [vmem:[#allocation11 + $0x18] sm:$0xff] }
 0x304   :  { %v5576_v18 = vpop.f32.mrb[21].mxu1  ;;  %4647 = vmatprep.subr.bf16.mxu0 %v6571_v38  ;;  %vm4917_vm4 = vcmp.ge.u32.totalorder %v4911_v28, 858993459 }
 0x305   :  { %v5577_v52 = vadd.f32 %v5576_v18, %v5575_v41  ;;  %v5578_v48 = vpop.f32.mrb[22].mxu1  ;;  %v4912_v41 = vld [vmem:[#allocation11 + $0x20] sm:$0xff] }
 0x306   :  { %v5579_v53 = vpop.f32.mrb[23].mxu1  ;;  %vm4918_vm5 = vcmp.ge.u32.totalorder %v4912_v41, 858993459 }
 0x307   :  { %v4738_v55 = vadd.f32 %v5577_v52, %v4697_v49  ;;  %4648 = vmatpush1.bf16.msra.mxu0 %v6569_v45  ;;  %v5580_v56 = vadd.f32 %v5579_v53, %v5578_v48 }
 0x308   :  { %4649 = vmatprep.subr.bf16.mxu0 %v6574_v46 }
 0x309   :  { %v4741_v59 = vadd.f32 %v5580_v56, %v4700_v54 }
 0x30b   :  { %4650 = vmatpush1.bf16.msra.mxu0 %v6572_v58 }
 0x30e   :  { %4652 = vmatmul.mubr.bf16.vlgmr.msra.gmra.mrb[8].mxu0 %v6974_v16 }
 0x323   :  { %v5597_v42 = vpop.f32.mrb[24].mxu1 }
 0x324   :  { %v5598_v60 = vpop.f32.mrb[25].mxu1 }
 0x325   :  { %v5599_v61 = vadd.f32 %v5598_v60, %v5597_v42  ;;  %v5600_v62 = vpop.f32.mrb[26].mxu1 }
 0x326   :  { %v5601_v0 = vpop.f32.mrb[27].mxu1 }
 0x327   :  { %v4779_v1 = vadd.f32 %v5599_v61, %v4738_v55  ;;  %v5602_v2 = vadd.f32 %v5601_v0, %v5600_v62 }
 0x329   :  { %v4782_v3 = vadd.f32 %v5602_v2, %v4741_v59 }
 0x343   :  { %v5619_v43 = vpop.f32.mrb[28].mxu1 }
 0x344   :  { %v5620_v40 = vpop.f32.mrb[29].mxu1 }
 0x345   :  { %v5621_v34 = vadd.f32 %v5620_v40, %v5619_v43  ;;  %v5622_v5 = vpop.f32.mrb[30].mxu1 }
 0x346   :  { %v5623_v8 = vpop.f32.mrb[31].mxu1 }
 0x347   :  { %v4820_v9 = vadd.f32 %v5621_v34, %v4779_v1  ;;  %v5624_v10 = vadd.f32 %v5623_v8, %v5622_v5 }
 0x349   :  { %v4823_v11 = vadd.f32 %v5624_v10, %v4782_v3 }
 0x363   :  { %v5641_v12 = vpop.f32.mrb[32].mxu1 }
 0x364   :  { %v5642_v13 = vpop.f32.mrb[33].mxu1 }
 0x365   :  { %v5643_v14 = vadd.f32 %v5642_v13, %v5641_v12  ;;  %v5644_v16 = vpop.f32.mrb[34].mxu1 }
 0x366   :  { %v5645_v4 = vpop.f32.mrb[35].mxu1 }
 0x367   :  { %v4861_v7 = vadd.f32 %v5643_v14, %v4820_v9  ;;  %v5646_v15 = vadd.f32 %v5645_v4, %v5644_v16 }
 0x369   :  { %v4864_v47 = vadd.f32 %v5646_v15, %v4823_v11 }
 0x3a1   :  { %v5663_v50 = vpop.f32.mrb[36].mxu1 }
 0x3a2   :  { %v5664_v51 = vpop.f32.mrb[37].mxu1 }
 0x3a3   :  { %v5665_v63 = vadd.f32 %v5664_v51, %v5663_v50  ;;  %v5666_v19 = vpop.f32.mrb[38].mxu1 }
 0x3a4   :  { %v5667_v20 = vpop.f32.mrb[39].mxu1 }
 0x3a5   :  { %v4902_v57 = vadd.f32 %v5665_v63, %v4861_v7  ;;  %v5668_v21 = vadd.f32 %v5667_v20, %v5666_v19 }
 0x3a7   :  { %v4922_v23 = vmul.f32 1.25, %v4902_v57  ;;  %v4905_v24 = vadd.f32 %v5668_v21, %v4864_v47 }
 0x3a9   :  { %v4928_v25 = vsel %vm4916_vm0, %v4922_v23, 0.0  ;;  %v4925_v26 = vmul.f32 1.25, %v4905_v24 }
 0x3aa   :  { %4934 = vst [vmem:[#allocation13 + $0x10] sm:$0xff] %v4928_v25 }
 0x3ab   :  { %v4931_v27 = vsel %vm4919_vm1, %v4925_v26, 0.0 }
 0x3ac   :  { %4937 = vst [vmem:[#allocation13 + $0x28] sm:$0xff] %v4931_v27 }
 0x3e1   :  { %v4653_v32 = vpop.f32.mrb[8].mxu0 }
 0x3e2   :  { %v5693_v35 = vadd.f32 %v4653_v32, %v2856_v29  ;;  %v4655_v36 = vpop.f32.mrb[9].mxu0 }
 0x3e3   :  { %v5694_v38 = vadd.f32 %v4655_v36, %v2860_v30  ;;  %v4657_v39 = vpop.f32.mrb[10].mxu0 }
 0x3e4   :  { %v4920_v45 = vmul.f32 1.25, %v5693_v35  ;;  %v5695_v18 = vadd.f32 %v4657_v39, %v2856_v29  ;;  %v4659_v46 = vpop.f32.mrb[11].mxu0 }
 0x3e5   :  { %v4921_v49 = vmul.f32 1.25, %v5694_v38  ;;  %v5696_v44 = vadd.f32 %v4659_v46, %v2860_v30 }
 0x3e6   :  { %v4926_v6 = vsel %vm4914_vm2, %v4920_v45, 0.0  ;;  %v4923_v37 = vmul.f32 1.25, %v5695_v18 }
 0x3e7   :  { %4932 = vst [vmem:[#allocation13] sm:$0xff] %v4926_v6  ;;  %v4927_v52 = vsel %vm4915_vm3, %v4921_v49, 0.0  ;;  %v4924_v48 = vmul.f32 1.25, %v5696_v44 }
 0x3e8   :  { %4933 = vst [vmem:[#allocation13 + $0x8] sm:$0xff] %v4927_v52  ;;  %v4929_v53 = vsel %vm4917_vm4, %v4923_v37, 0.0 }
 0x3e9   :  { %4935 = vst [vmem:[#allocation13 + $0x18] sm:$0xff] %v4929_v53  ;;  %v4930_v54 = vsel %vm4918_vm5, %v4924_v48, 0.0 }
 0x3ea   :  { %4936 = vst [vmem:[#allocation13 + $0x20] sm:$0xff] %v4930_v54 }
 0x3eb   :  { %6722 = shalt.err (!%p6719_p10)
}
 0x3ec   :  { %s6723_s23 = scalar_lea.hbm %s7008_s6, 768 }
 0x3ed   :  { %p6724_p11 = scmp.ne.s32.totalorder %s7008_s6, %s6723_s23  ;;  %p6727_p12 = scmp.lt.u32.totalorder %s6723_s23, %s7008_s6 }
 0x3ef   :  { %p6729_p13 = pnand %p6727_p12, %p6724_p11 }
 0x3f1   :  { %6732 = shalt.err (!%p6729_p13)
}
 0x3f2   :  { %4949 = dma.vmem_to_hbm [thread:$0]  %s4944_s1, 768, %s7008_s6, [#allocation4], %s6753_s4, %s6753_s4, %s6754_s15  }
 0x3f3   :  { %6741 = dma.done.wait [#allocation4], 768  }
 0x3f4   :  { %6742 = vsyncadd [#allocation4], 4294966528 }
 0x3f5   :  { %4953 = vsyncpa [#allocation3], 1 }
 0x3f6   :  { %4954 = vsyncpa [#allocation6], 1 }
 0x3f7   :  { %4955 = vsyncpa [#allocation9], 1 }
 0x3f8   :  { %4956 = vsyncpa [#allocation12], 1 }
 0x3f9   :  { %4957 = vsyncpa [#allocation4], 1 }

</bundles_post_ra>
